<compile_context>
chip_gen: v6e
topology: v6e:2x2x1
jax: 0.10.0
libtpu: 0.0.40
codegen_flags: <defaults>
</compile_context>

<pallas_src>
import math

import jax
import jax.numpy as jnp
from jax import lax
from jax.experimental import pallas as pl
from jax.experimental.pallas import tpu as pltpu


# -----------------------------------------------------------------------------
# Pallas attention kernel (the hot path of MSARNet.forward)
# -----------------------------------------------------------------------------
def _make_attn_kernel(bb: int, seq_len: int, channels: int):
    scale = 1.0 / math.sqrt(float(channels))

    def attn_kernel(x_ref, w_ref, o_ref):
        # x_ref: (bb, N, C) bf16   w_ref: (C, 3C) bf16   o_ref: (bb, N, C) f32
        # Fold the batch block into the projection M-dimension and fuse Wq|Wk|Wv into one
        # (C, 3C) RHS so the MXU weight push is amortized over bb*N rows.
        x2d = x_ref[...].reshape(bb * seq_len, channels)               # (bb*N, C) bf16
        qkv = jnp.dot(x2d, w_ref[...],
                      preferred_element_type=jnp.float32)              # (bb*N, 3C) f32
        qkv = qkv.reshape(bb, seq_len, 3 * channels)
        # Lane-aligned slices (multiples of 128): no re-layout.
        q = qkv[:, :, :channels].astype(jnp.bfloat16)
        k = qkv[:, :, channels:2 * channels].astype(jnp.bfloat16)
        v = qkv[:, :, 2 * channels:].astype(jnp.bfloat16)

        # Scores: contract the last dims directly — no explicit K transpose.
        s = jnp.einsum("bqd,bkd->bqk", q, k,
                       preferred_element_type=jnp.float32) * scale     # (bb, N, N) f32
        m = jnp.max(s, axis=-1, keepdims=True)
        e = jnp.exp(s - m)
        denom = jnp.sum(e, axis=-1, keepdims=True)
        p = e * pl.reciprocal(denom, approx=True)                      # softmax in f32 (EUP)
        o = jnp.einsum("bqk,bkd->bqd", p.astype(jnp.bfloat16), v,
                       preferred_element_type=jnp.float32)             # (bb, N, C) f32
        o_ref[...] = o.astype(o_ref.dtype)

    return attn_kernel


def _pick_batch_block(batch: int) -> int:
    """Largest divisor of `batch` that keeps >= 2 grid steps (v7x has 2 TensorCores)."""
    if batch < 2:
        return 1
    bb = batch // 2
    while batch % bb:
        bb -= 1
    return bb


def robust_method_attention(x_seq, wq, wk, wv):
    """Single-head scaled dot-product attention over (B, N, C).  Returns the output only.

    The (B, N, N) attention-weights tensor is never consumed by MSARNet.forward, so it is
    not produced by the kernel.
    """
    B, N, C = x_seq.shape
    bb = _pick_batch_block(B)
    grid = (B // bb,)

    w_qkv = jnp.concatenate([wq, wk, wv], axis=1).astype(jnp.bfloat16)   # (C, 3C)
    x_bf16 = x_seq.astype(jnp.bfloat16)

    flops = 2 * B * N * C * (3 * C) + 2 * 2 * B * N * N * C
    bytes_accessed = B * N * C * 2 + C * 3 * C * 2 + B * N * C * 4
    cost = pl.CostEstimate(flops=flops, transcendentals=B * N * N,
                           bytes_accessed=bytes_accessed)

    out = pl.pallas_call(
        _make_attn_kernel(bb, N, C),
        out_shape=jax.ShapeDtypeStruct((B, N, C), jnp.float32),
        grid=grid,
        in_specs=[
            pl.BlockSpec((bb, N, C), lambda i: (i, 0, 0)),
            pl.BlockSpec((C, 3 * C), lambda i: (0, 0)),   # constant block: fetched once
        ],
        out_specs=pl.BlockSpec((bb, N, C), lambda i: (i, 0, 0)),
        compiler_params=pltpu.CompilerParams(dimension_semantics=("parallel",)),
        cost_estimate=cost,
    )(x_bf16, w_qkv)
    return out


# -----------------------------------------------------------------------------
# ResNet-18 backbone (forward_without_fc) — plain-JAX glue, NHWC + bf16 convs
# -----------------------------------------------------------------------------
def _conv(x, w, stride, padding):
    # bf16 operands run at native MXU rate on v5e/v6e/v7x; accumulate in f32.
    return lax.conv_general_dilated(
        x.astype(jnp.bfloat16), w.astype(jnp.bfloat16),
        (stride, stride), padding,
        dimension_numbers=("NHWC", "HWIO", "NHWC"),
        preferred_element_type=jnp.float32)


def _max_pool_3x3_s2(x):
    return lax.reduce_window(
        x, -jnp.inf, lax.max,
        window_dimensions=(1, 3, 3, 1),
        window_strides=(1, 2, 2, 1),
        padding=((0, 0), (1, 1), (1, 1), (0, 0)))


def _conv_init(key, out_c, in_c, k):
    fan_in = in_c * k * k
    return (jax.random.normal(key, (k, k, in_c, out_c), jnp.float32)   # HWIO
            * math.sqrt(2.0 / fan_in))


def make_resnet18_params(key, input_channels=3):
    keys = iter(jax.random.split(key, 64))
    params = {"stem": _conv_init(next(keys), 64, input_channels, 7), "layers": []}
    in_c = 64
    for out_c, n_blocks, stride in [(64, 2, 1), (128, 2, 2), (256, 2, 2), (512, 2, 2)]:
        layer = []
        for bi in range(n_blocks):
            s = stride if bi == 0 else 1
            bp = {
                "conv1": _conv_init(next(keys), out_c, in_c, 3),
                "conv2": _conv_init(next(keys), out_c, out_c, 3),
            }
            if s != 1 or in_c != out_c:
                bp["down"] = _conv_init(next(keys), out_c, in_c, 1)
            layer.append(bp)
            in_c = out_c
        params["layers"].append(layer)
    return params


def _basic_block(x, p, stride):
    # Conv accumulation, residual add and ReLU in f32; store the block output in bf16 so
    # inter-block feature maps cost half the HBM bandwidth (cast fuses into the conv epilogue).
    out = jax.nn.relu(_conv(x, p["conv1"], stride, ((1, 1), (1, 1))))
    out = _conv(out, p["conv2"], 1, ((1, 1), (1, 1)))
    if "down" in p:
        shortcut = _conv(x, p["down"], stride, ((0, 0), (0, 0)))
    else:
        shortcut = x                                   # bf16 -> promoted to f32 in the add
    return jax.nn.relu(out + shortcut).astype(jnp.bfloat16)


def resnet18_forward_without_fc(x_nchw, params):
    x = jnp.transpose(x_nchw, (0, 2, 3, 1))                 # NCHW -> NHWC once
    x = jax.nn.relu(_conv(x, params["stem"], 2, ((3, 3), (3, 3))))   # f32
    x = _max_pool_3x3_s2(x)                                  # f32 pool (safe -inf init)
    x = x.astype(jnp.bfloat16)
    layer_strides = [1, 2, 2, 2]
    for layer, st in zip(params["layers"], layer_strides):
        for bi, bp in enumerate(layer):
            x = _basic_block(x, bp, st if bi == 0 else 1)
    return x  # (B, H', W', 512) bf16  -- no avgpool, no fc


# -----------------------------------------------------------------------------
# MSARNet forward
# -----------------------------------------------------------------------------
def msarnet_forward(x, resnet_params, attn_params):
    wq, wk, wv = attn_params
    feat = resnet18_forward_without_fc(x, resnet_params)     # (B, H, W, C) NHWC bf16
    B, H, W, C = feat.shape

    # NHWC already matches the attention sequence layout (B, N = H*W, C): no HBM transpose.
    x_seq = feat.reshape(B, H * W, C)

    # 'self', 'spatial' and 'global' branches call the same robust_method on byte-identical
    # inputs/weights -> compute the attention ONCE and reuse the result for all branches.
    attn_out = robust_method_attention(x_seq, wq, wk, wv)     # (B, N, C) f32

    # Reproduce PyTorch order: each branch viewed as (B, C, H, W), concatenated on dim=1,
    # then flattened.  (Three identical branches -> tile of one flattened branch.)
    branch_flat = jnp.transpose(attn_out, (0, 2, 1)).reshape(B, C * H * W)
    num_branches = 3                                          # 'self', 'spatial', 'global'
    return jnp.tile(branch_flat, (1, num_branches))           # (B, 3*C*H*W)


# -----------------------------------------------------------------------------
# Driver
# -----------------------------------------------------------------------------
if __name__ == "__main__":
    key = jax.random.PRNGKey(0)
    k_x, k_resnet, k_attn = jax.random.split(key, 3)

    B, IN_C, HW = 2, 3, 128            # small input; ResNet-18 -> (B, 4, 4, 512)
    VALUE_DIM = 512                    # 512 * BasicBlock.expansion (depth=18)

    x = jax.random.normal(k_x, (B, IN_C, HW, HW), jnp.float32)
    resnet_params = make_resnet18_params(k_resnet, input_channels=IN_C)

    kq, kk, kv = jax.random.split(k_attn, 3)
    wscale = 1.0 / math.sqrt(VALUE_DIM)
    wq = jax.random.normal(kq, (VALUE_DIM, VALUE_DIM), jnp.float32) * wscale
    wk = jax.random.normal(kk, (VALUE_DIM, VALUE_DIM), jnp.float32) * wscale
    wv = jax.random.normal(kv, (VALUE_DIM, VALUE_DIM), jnp.float32) * wscale

    fwd = jax.jit(msarnet_forward)
    out = fwd(x, resnet_params, (wq, wk, wv))
    out = jax.block_until_ready(out)

    expected = (B, 3 * VALUE_DIM * 4 * 4)   # 3 attention branches concatenated, flattened
    assert out.shape == expected, f"got {out.shape}, expected {expected}"
    assert bool(jnp.all(jnp.isfinite(out)))
    print("KERNEL_OK")
</pallas_src>

<mosaic_0001>
module attributes {stable_mosaic.version = 11 : i64} {
  func.func @attn_kernel(%arg0: i32, %arg1: memref<1x16x512xbf16, #tpu.memory_space<vmem>>, %arg2: memref<512x1536xbf16, #tpu.memory_space<vmem>>, %arg3: memref<1x16x512xf32, #tpu.memory_space<vmem>>) attributes {dimension_semantics = [#tpu.dimension_semantics<parallel>], iteration_bounds = array<i64: 2>, scalar_prefetch = 0 : i64, scratch_operands = 0 : i64, tpu.core_type = #tpu.core_type<tc>, window_params = [{transform_indices = @transform_0, window_bounds = array<i64: 1, 16, 512>}, {pipeline_mode = #tpu.pipeline_mode<synchronous>, transform_indices = @transform_1, window_bounds = array<i64: 512, 1536>}, {transform_indices = @transform_2, window_bounds = array<i64: 1, 16, 512>}]} {
    %c0 = arith.constant 0 : index
    %c0_0 = arith.constant 0 : index
    %c0_1 = arith.constant 0 : index
    %0 = vector.load %arg1[%c0, %c0_0, %c0_1] : memref<1x16x512xbf16, #tpu.memory_space<vmem>>, vector<1x16x512xbf16>
    %1 = vector.shape_cast %0 : vector<1x16x512xbf16> to vector<16x512xbf16>
    %c0_2 = arith.constant 0 : index
    %c0_3 = arith.constant 0 : index
    %2 = vector.load %arg2[%c0_2, %c0_3] : memref<512x1536xbf16, #tpu.memory_space<vmem>>, vector<512x1536xbf16>
    %cst = arith.constant dense<0.000000e+00> : vector<16x1536xf32>
    %3 = tpu.matmul %1, %2, %cst {dimension_numbers = #tpu.dot_dimension_numbers<[1], [0], [0], [1], [0, 0, 1, 1], [], []>} : vector<16x512xbf16>, vector<512x1536xbf16>, vector<16x1536xf32> -> vector<16x1536xf32>
    %4 = vector.shape_cast %3 : vector<16x1536xf32> to vector<1x16x1536xf32>
    %5 = vector.extract_strided_slice %4 {offsets = [0, 0, 0], sizes = [1, 16, 512], strides = [1, 1, 1]} : vector<1x16x1536xf32> to vector<1x16x512xf32>
    %6 = arith.truncf %5 : vector<1x16x512xf32> to vector<1x16x512xbf16>
    %7 = vector.extract_strided_slice %4 {offsets = [0, 0, 512], sizes = [1, 16, 512], strides = [1, 1, 1]} : vector<1x16x1536xf32> to vector<1x16x512xf32>
    %8 = arith.truncf %7 : vector<1x16x512xf32> to vector<1x16x512xbf16>
    %9 = vector.extract_strided_slice %4 {offsets = [0, 0, 1024], sizes = [1, 16, 512], strides = [1, 1, 1]} : vector<1x16x1536xf32> to vector<1x16x512xf32>
    %10 = arith.truncf %9 : vector<1x16x512xf32> to vector<1x16x512xbf16>
    "tpu.trace_start"() <{level = 10 : i32, message = "bqd,bkd->bqk"}> : () -> ()
    %cst_4 = arith.constant dense<0.000000e+00> : vector<1x16x16xf32>
    %11 = tpu.matmul %6, %8, %cst_4 {dimension_numbers = #tpu.dot_dimension_numbers<[2], [2], [1], [1], [0, 0, 0, 1, 1, 1], [0], [0]>} : vector<1x16x512xbf16>, vector<1x16x512xbf16>, vector<1x16x16xf32> -> vector<1x16x16xf32>
    "tpu.trace_stop"() : () -> ()
    %cst_5 = arith.constant 0.0441941731 : f32
    %12 = vector.broadcast %cst_5 : f32 to vector<1x16x16xf32>
    %13 = arith.mulf %11, %12 : vector<1x16x16xf32>
    %cst_6 = arith.constant dense<0xFF800000> : vector<1x16xf32>
    %14 = vector.multi_reduction <maximumf>, %13, %cst_6 [2] : vector<1x16x16xf32> to vector<1x16xf32>
    %15 = vector.shape_cast %14 : vector<1x16xf32> to vector<1x16x1xf32>
    %16 = vector.broadcast %15 : vector<1x16x1xf32> to vector<1x16x16xf32>
    %17 = arith.subf %13, %16 : vector<1x16x16xf32>
    %18 = math.exp %17 : vector<1x16x16xf32>
    %cst_7 = arith.constant dense<0.000000e+00> : vector<1x16xf32>
    %19 = vector.multi_reduction <add>, %18, %cst_7 [2] : vector<1x16x16xf32> to vector<1x16xf32>
    %20 = vector.shape_cast %19 : vector<1x16xf32> to vector<1x16x1xf32>
    %21 = tpu.reciprocal %20 {approx = true} : vector<1x16x1xf32> -> vector<1x16x1xf32>
    %22 = vector.broadcast %21 : vector<1x16x1xf32> to vector<1x16x16xf32>
    %23 = arith.mulf %18, %22 : vector<1x16x16xf32>
    %24 = arith.truncf %23 : vector<1x16x16xf32> to vector<1x16x16xbf16>
    "tpu.trace_start"() <{level = 10 : i32, message = "bqk,bkd->bqd"}> : () -> ()
    %cst_8 = arith.constant dense<0.000000e+00> : vector<1x16x512xf32>
    %25 = tpu.matmul %24, %10, %cst_8 {dimension_numbers = #tpu.dot_dimension_numbers<[2], [1], [1], [2], [0, 0, 0, 1, 1, 2], [0], [0]>} : vector<1x16x16xbf16>, vector<1x16x512xbf16>, vector<1x16x512xf32> -> vector<1x16x512xf32>
    "tpu.trace_stop"() : () -> ()
    %c0_9 = arith.constant 0 : index
    %c0_10 = arith.constant 0 : index
    %c0_11 = arith.constant 0 : index
    %26 = vector.load %arg3[%c0_9, %c0_10, %c0_11] : memref<1x16x512xf32, #tpu.memory_space<vmem>>, vector<1x16x512xf32>
    tpu.vector_store %arg3[%c0_9, %c0_10, %c0_11], %25 {strides = array<i32>} : memref<1x16x512xf32, #tpu.memory_space<vmem>>, vector<1x16x512xf32>,
    return
  }
  func.func @transform_0(%arg0: i32) -> (i32, i32, i32) {
    %c0_i32 = arith.constant 0 : i32
    %c0_i32_0 = arith.constant 0 : i32
    %c0_i32_1 = arith.constant 0 : i32
    return %arg0, %c0_i32, %c0_i32_0 : i32, i32, i32
  }
  func.func @transform_1(%arg0: i32) -> (i32, i32) {
    %c0_i32 = arith.constant 0 : i32
    %c0_i32_0 = arith.constant 0 : i32
    %c0_i32_1 = arith.constant 0 : i32
    return %c0_i32, %c0_i32_0 : i32, i32
  }
  func.func @transform_2(%arg0: i32) -> (i32, i32, i32) {
    %c0_i32 = arith.constant 0 : i32
    %c0_i32_0 = arith.constant 0 : i32
    %c0_i32_1 = arith.constant 0 : i32
    return %arg0, %c0_i32, %c0_i32_0 : i32, i32, i32
  }
}

</mosaic_0001>

<bundles_post_ra>
// kernel: msarnet_forward.1
= control target key start
LH: loop header
LB: loop body
LE: loop exit
PB: predicated region body
PF: predicated region fallthrough
CT: control target
= control target key end

     0   :  { %s4291_s9 = smov 0   ;;  %s5563_s0 = inlined_call_operand.vmem [shape: bf16[2,16,512], index: 0, kind: input, shape index: {}]   ;;  %s5564_s1 = inlined_call_operand.vmem [shape: bf16[512,1536], index: 1, kind: input, shape index: {}]   ;;  %s5565_s2 = inlined_call_operand.vmem [shape: f32[2,16,512], index: 2, kind: output, shape index: {}]  }
   0x1 LB: > { %s3261_s10 = sadd.s32 4294967295, %s4273_s9   ;;  %p3265_p0 = scmp.ge.s32.totalorder %s4273_s9, 1  ;;  %s4273_s9 = sphi %s4291_s9, %s12_s9  }
   0x2   : > { %p112_p1 = scmp.lt.s32.totalorder %s4273_s9, 3 }
   0x4   : > { %p113_p2 = pnand %p3265_p0, %p112_p1 }
   0x5   : > { %p134_p3 = scmp.lt.s32.totalorder (!%p113_p2), %s3261_s10, 1 }
   0x6   : > { %116 = sbr.rel (%p113_p2) target bundleno = 1195 (0x4ab), region = 28 }
   0xb   : > { %v3673_v0 = vld [vmem:[%s5564_s1 + $0x2a4] ss:$48 sps:$4 sm:$0xff]   ;;  %v3677_v2 = vld [vmem:[%s5564_s1 + $0x2a0] ss:$48 sps:$4 sm:$0xff]   ;;  %s5567_s10 = smov (!%p134_p3, %s3261_s10), 1  ;;  %vm3085_vm0 = vcmask 130048  }
   0xc   : > { %v3675_v1 = vld [vmem:[%s5564_s1 + $0x8a4] ss:$48 sps:$4 sm:$0xff]   ;;  %2473 = vmatprep.subr.bf16.mxu0 %v3673_v0  ;;  %v3678_v3 = vld [vmem:[%s5564_s1 + $0x8a0] ss:$48 sps:$4 sm:$0xff]   ;;  %s3662_s17 = sshll.u32 %s5567_s10, 5  ;;  %s3663_s19 = sshll.u32 %s5567_s10, 6 }
   0xd   : > { %2516 = vmatprep.subr.bf16.mxu1 %v3675_v1  ;;  %v3679_v4 = vld [vmem:[%s5564_s1 + $0x244] ss:$48 sps:$4 sm:$0xff]   ;;  %2474 = vmatpush1.bf16.msra.mxu0 %v3677_v2  ;;  %v3683_v6 = vld [vmem:[%s5564_s1 + $0x240] ss:$48 sps:$4 sm:$0xff]   ;;  %s4444_s26 = scalar_lea.vmem %s5563_s0, %s3662_s17  ;;  %v3777_v2 = vld [vmem:[%s5564_s1 + $0x2ac] ss:$48 sps:$4 sm:$0xff]   ;;  %s143_s22 = scalar_lea.vmem %s5565_s2, %s3663_s19 }
   0xe   : > { %2517 = vmatpush1.bf16.msra.mxu1 %v3678_v3  ;;  %v3681_v5 = vld [vmem:[%s5564_s1 + $0x844] ss:$48 sps:$4 sm:$0xff]   ;;  %2475 = vmatprep.subr.bf16.mxu0 %v3679_v4  ;;  %v3684_v7 = vld [vmem:[%s5564_s1 + $0x840] ss:$48 sps:$4 sm:$0xff]   ;;  %v4462_v50 = vld [vmem:[%s4444_s26 + $0xc] ss:$16 sps:$4 sm:$0xff]  }
   0xf   : > { %2518 = vmatprep.subr.bf16.mxu1 %v3681_v5  ;;  %v3685_v8 = vld [vmem:[%s5564_s1 + $0x1e4] ss:$48 sps:$4 sm:$0xff]   ;;  %v3689_v10 = vld [vmem:[%s5564_s1 + $0x1e0] ss:$48 sps:$4 sm:$0xff]   ;;  %2548 = vmatprep.mubr.bf16.mxu1 %v4462_v50  ;;  %v3780_v3 = vld [vmem:[%s5564_s1 + $0x8ac] ss:$48 sps:$4 sm:$0xff]  }
  0x10   : > { %v3687_v9 = vld [vmem:[%s5564_s1 + $0x7e4] ss:$48 sps:$4 sm:$0xff]   ;;  %v3690_v11 = vld [vmem:[%s5564_s1 + $0x7e0] ss:$48 sps:$4 sm:$0xff]   ;;  %v4521_v5 = vld [vmem:[%s4444_s26 + $0x8] ss:$16 sps:$4 sm:$0xff]  }
  0x11   : > { %2476 = vmatpush1.bf16.msra.mxu0 %v3683_v6  ;;  %v3691_v12 = vld [vmem:[%s5564_s1 + $0x184] ss:$48 sps:$4 sm:$0xff]   ;;  %v3695_v14 = vld [vmem:[%s5564_s1 + $0x180] ss:$48 sps:$4 sm:$0xff]   ;;  %v3775_v6 = vld [vmem:[%s5564_s1 + $0x2a8] ss:$48 sps:$4 sm:$0xff]  }
  0x12   : > { %2519 = vmatpush1.bf16.msra.mxu1 %v3684_v7  ;;  %2477 = vmatprep.subr.bf16.mxu0 %v3685_v8  ;;  %v3693_v13 = vld [vmem:[%s5564_s1 + $0x784] ss:$48 sps:$4 sm:$0xff]   ;;  %v3696_v15 = vld [vmem:[%s5564_s1 + $0x780] ss:$48 sps:$4 sm:$0xff]   ;;  %v3778_v7 = vld [vmem:[%s5564_s1 + $0x8a8] ss:$48 sps:$4 sm:$0xff]  }
  0x13   : > { %2520 = vmatprep.subr.bf16.mxu1 %v3687_v9  ;;  %v3697_v16 = vld [vmem:[%s5564_s1 + $0x124] ss:$48 sps:$4 sm:$0xff]   ;;  %v3701_v18 = vld [vmem:[%s5564_s1 + $0x120] ss:$48 sps:$4 sm:$0xff]   ;;  %v3783_v8 = vld [vmem:[%s5564_s1 + $0x24c] ss:$48 sps:$4 sm:$0xff]  }
  0x14   : > { %v3699_v17 = vld [vmem:[%s5564_s1 + $0x724] ss:$48 sps:$4 sm:$0xff]   ;;  %v3702_v19 = vld [vmem:[%s5564_s1 + $0x720] ss:$48 sps:$4 sm:$0xff]   ;;  %v3786_v9 = vld [vmem:[%s5564_s1 + $0x84c] ss:$48 sps:$4 sm:$0xff]  }
  0x15   : > { %2478 = vmatpush1.bf16.msra.mxu0 %v3689_v10  ;;  %v3703_v20 = vld [vmem:[%s5564_s1 + $0xc4] ss:$48 sps:$4 sm:$0xff]   ;;  %v3707_v22 = vld [vmem:[%s5564_s1 + $0xc0] ss:$48 sps:$4 sm:$0xff]   ;;  %v3781_v10 = vld [vmem:[%s5564_s1 + $0x248] ss:$48 sps:$4 sm:$0xff]  }
  0x16   : > { %2521 = vmatpush1.bf16.msra.mxu1 %v3690_v11  ;;  %2479 = vmatprep.subr.bf16.mxu0 %v3691_v12  ;;  %v3705_v21 = vld [vmem:[%s5564_s1 + $0x6c4] ss:$48 sps:$4 sm:$0xff]   ;;  %v3708_v23 = vld [vmem:[%s5564_s1 + $0x6c0] ss:$48 sps:$4 sm:$0xff]   ;;  %v3784_v11 = vld [vmem:[%s5564_s1 + $0x848] ss:$48 sps:$4 sm:$0xff]  }
  0x17   : > { %2522 = vmatprep.subr.bf16.mxu1 %v3693_v13  ;;  %v3709_v24 = vld [vmem:[%s5564_s1 + $0x64] ss:$48 sps:$4 sm:$0xff]   ;;  %v3713_v26 = vld [vmem:[%s5564_s1 + $0x60] ss:$48 sps:$4 sm:$0xff]   ;;  %v3789_v12 = vld [vmem:[%s5564_s1 + $0x1ec] ss:$48 sps:$4 sm:$0xff]  }
  0x18   : > { %v3711_v25 = vld [vmem:[%s5564_s1 + $0x664] ss:$48 sps:$4 sm:$0xff]   ;;  %v3714_v27 = vld [vmem:[%s5564_s1 + $0x660] ss:$48 sps:$4 sm:$0xff]   ;;  %v3792_v13 = vld [vmem:[%s5564_s1 + $0x7ec] ss:$48 sps:$4 sm:$0xff]  }
  0x19   : > { %2480 = vmatpush1.bf16.msra.mxu0 %v3695_v14  ;;  %v3715_v28 = vld [vmem:[%s5564_s1 + $0x4] ss:$48 sps:$4 sm:$0xff]   ;;  %v3719_v30 = vld [vmem:[%s5564_s1] ss:$48 sps:$4 sm:$0xff]   ;;  %v3787_v14 = vld [vmem:[%s5564_s1 + $0x1e8] ss:$48 sps:$4 sm:$0xff]  }
  0x1a   : > { %2523 = vmatpush1.bf16.msra.mxu1 %v3696_v15  ;;  %2481 = vmatprep.subr.bf16.mxu0 %v3697_v16  ;;  %v3717_v29 = vld [vmem:[%s5564_s1 + $0x604] ss:$48 sps:$4 sm:$0xff]   ;;  %v3720_v31 = vld [vmem:[%s5564_s1 + $0x600] ss:$48 sps:$4 sm:$0xff]   ;;  %v3790_v15 = vld [vmem:[%s5564_s1 + $0x7e8] ss:$48 sps:$4 sm:$0xff]  }
  0x1b   : > { %2524 = vmatprep.subr.bf16.mxu1 %v3699_v17  ;;  %v3721_v32 = vld [vmem:[%s5564_s1 + $0x5a4] ss:$48 sps:$4 sm:$0xff]   ;;  %v3725_v34 = vld [vmem:[%s5564_s1 + $0x5a0] ss:$48 sps:$4 sm:$0xff]   ;;  %v3795_v16 = vld [vmem:[%s5564_s1 + $0x18c] ss:$48 sps:$4 sm:$0xff]  }
  0x1c   : > { %v3723_v33 = vld [vmem:[%s5564_s1 + $0xba4] ss:$48 sps:$4 sm:$0xff]   ;;  %v3726_v35 = vld [vmem:[%s5564_s1 + $0xba0] ss:$48 sps:$4 sm:$0xff]   ;;  %v3798_v17 = vld [vmem:[%s5564_s1 + $0x78c] ss:$48 sps:$4 sm:$0xff]  }
  0x1d   : > { %2482 = vmatpush1.bf16.msra.mxu0 %v3701_v18  ;;  %v3727_v36 = vld [vmem:[%s5564_s1 + $0x544] ss:$48 sps:$4 sm:$0xff]   ;;  %v3731_v38 = vld [vmem:[%s5564_s1 + $0x540] ss:$48 sps:$4 sm:$0xff]   ;;  %v3793_v18 = vld [vmem:[%s5564_s1 + $0x188] ss:$48 sps:$4 sm:$0xff]  }
  0x1e   : > { %2525 = vmatpush1.bf16.msra.mxu1 %v3702_v19  ;;  %2483 = vmatprep.subr.bf16.mxu0 %v3703_v20  ;;  %v3729_v37 = vld [vmem:[%s5564_s1 + $0xb44] ss:$48 sps:$4 sm:$0xff]   ;;  %v3732_v39 = vld [vmem:[%s5564_s1 + $0xb40] ss:$48 sps:$4 sm:$0xff]   ;;  %v3796_v19 = vld [vmem:[%s5564_s1 + $0x788] ss:$48 sps:$4 sm:$0xff]  }
  0x1f   : > { %2526 = vmatprep.subr.bf16.mxu1 %v3705_v21  ;;  %v3733_v40 = vld [vmem:[%s5564_s1 + $0x4e4] ss:$48 sps:$4 sm:$0xff]   ;;  %v3737_v42 = vld [vmem:[%s5564_s1 + $0x4e0] ss:$48 sps:$4 sm:$0xff]   ;;  %v3801_v20 = vld [vmem:[%s5564_s1 + $0x12c] ss:$48 sps:$4 sm:$0xff]  }
  0x20   : > { %v3735_v41 = vld [vmem:[%s5564_s1 + $0xae4] ss:$48 sps:$4 sm:$0xff]   ;;  %v3738_v43 = vld [vmem:[%s5564_s1 + $0xae0] ss:$48 sps:$4 sm:$0xff]   ;;  %v3804_v21 = vld [vmem:[%s5564_s1 + $0x72c] ss:$48 sps:$4 sm:$0xff]  }
  0x21   : > { %2484 = vmatpush1.bf16.msra.mxu0 %v3707_v22  ;;  %v3739_v44 = vld [vmem:[%s5564_s1 + $0x484] ss:$48 sps:$4 sm:$0xff]   ;;  %v3743_v46 = vld [vmem:[%s5564_s1 + $0x480] ss:$48 sps:$4 sm:$0xff]   ;;  %v3799_v22 = vld [vmem:[%s5564_s1 + $0x128] ss:$48 sps:$4 sm:$0xff]  }
  0x22   : > { %2527 = vmatpush1.bf16.msra.mxu1 %v3708_v23  ;;  %2485 = vmatprep.subr.bf16.mxu0 %v3709_v24  ;;  %v3741_v45 = vld [vmem:[%s5564_s1 + $0xa84] ss:$48 sps:$4 sm:$0xff]   ;;  %v3744_v47 = vld [vmem:[%s5564_s1 + $0xa80] ss:$48 sps:$4 sm:$0xff]   ;;  %v3802_v23 = vld [vmem:[%s5564_s1 + $0x728] ss:$48 sps:$4 sm:$0xff]  }
  0x23   : > { %2528 = vmatprep.subr.bf16.mxu1 %v3711_v25  ;;  %v4456_v48 = vld [vmem:[%s4444_s26 + $0x4] ss:$16 sps:$4 sm:$0xff]   ;;  %v3749_v52 = vld [vmem:[%s5564_s1 + $0x420] ss:$48 sps:$4 sm:$0xff]   ;;  %v3807_v24 = vld [vmem:[%s5564_s1 + $0xcc] ss:$48 sps:$4 sm:$0xff]  }
  0x24   : > { %v3745_v49 = vld [vmem:[%s5564_s1 + $0x424] ss:$48 sps:$4 sm:$0xff]   ;;  %2505 = vmatprep.mubr.bf16.mxu0 %v4456_v48  ;;  %v3750_v53 = vld [vmem:[%s5564_s1 + $0xa20] ss:$48 sps:$4 sm:$0xff]   ;;  %v3810_v25 = vld [vmem:[%s5564_s1 + $0x6cc] ss:$48 sps:$4 sm:$0xff]  }
  0x25   : > { %2486 = vmatpush1.bf16.msra.mxu0 %v3713_v26  ;;  %v3747_v51 = vld [vmem:[%s5564_s1 + $0xa24] ss:$48 sps:$4 sm:$0xff]   ;;  %v3755_v56 = vld [vmem:[%s5564_s1 + $0x3c0] ss:$48 sps:$4 sm:$0xff]   ;;  %v3805_v26 = vld [vmem:[%s5564_s1 + $0xc8] ss:$48 sps:$4 sm:$0xff]  }
  0x26   : > { %2529 = vmatpush1.bf16.msra.mxu1 %v3714_v27  ;;  %2487 = vmatprep.subr.bf16.mxu0 %v3715_v28  ;;  %v3751_v54 = vld [vmem:[%s5564_s1 + $0x3c4] ss:$48 sps:$4 sm:$0xff]   ;;  %v3756_v57 = vld [vmem:[%s5564_s1 + $0x9c0] ss:$48 sps:$4 sm:$0xff]   ;;  %v3808_v27 = vld [vmem:[%s5564_s1 + $0x6c8] ss:$48 sps:$4 sm:$0xff]  }
  0x27   : > { %2530 = vmatprep.subr.bf16.mxu1 %v3717_v29  ;;  %v3753_v55 = vld [vmem:[%s5564_s1 + $0x9c4] ss:$48 sps:$4 sm:$0xff]   ;;  %v3761_v60 = vld [vmem:[%s5564_s1 + $0x360] ss:$48 sps:$4 sm:$0xff]   ;;  %v3813_v28 = vld [vmem:[%s5564_s1 + $0x6c] ss:$48 sps:$4 sm:$0xff]  }
  0x28   : > { %v3757_v58 = vld [vmem:[%s5564_s1 + $0x364] ss:$48 sps:$4 sm:$0xff]   ;;  %v3762_v61 = vld [vmem:[%s5564_s1 + $0x960] ss:$48 sps:$4 sm:$0xff]   ;;  %v3816_v29 = vld [vmem:[%s5564_s1 + $0x66c] ss:$48 sps:$4 sm:$0xff]  }
  0x29   : > { %2488 = vmatpush1.bf16.msra.mxu0 %v3719_v30  ;;  %v3759_v59 = vld [vmem:[%s5564_s1 + $0x964] ss:$48 sps:$4 sm:$0xff]   ;;  %v3767_v0 = vld [vmem:[%s5564_s1 + $0x300] ss:$48 sps:$4 sm:$0xff]   ;;  %v3811_v30 = vld [vmem:[%s5564_s1 + $0x68] ss:$48 sps:$4 sm:$0xff]  }
  0x2a   : > { %2531 = vmatpush1.bf16.msra.mxu1 %v3720_v31  ;;  %2489 = vmatprep.subr.bf16.mxu0 %v3721_v32  ;;  %v3763_v62 = vld [vmem:[%s5564_s1 + $0x304] ss:$48 sps:$4 sm:$0xff]   ;;  %v3768_v1 = vld [vmem:[%s5564_s1 + $0x900] ss:$48 sps:$4 sm:$0xff]   ;;  %v3814_v31 = vld [vmem:[%s5564_s1 + $0x668] ss:$48 sps:$4 sm:$0xff]  }
  0x2b   : > { %2532 = vmatprep.subr.bf16.mxu1 %v3723_v33  ;;  %v3765_v63 = vld [vmem:[%s5564_s1 + $0x904] ss:$48 sps:$4 sm:$0xff]   ;;  %v4518_v4 = vld [vmem:[%s4444_s26] ss:$16 sps:$4 sm:$0xff]   ;;  %v3819_v32 = vld [vmem:[%s5564_s1 + $0xc] ss:$48 sps:$4 sm:$0xff]  }
  0x2c   : > { %v3822_v33 = vld [vmem:[%s5564_s1 + $0x60c] ss:$48 sps:$4 sm:$0xff]  }
  0x2d   : > { %2490 = vmatpush2.bf16.msra.mxu0 %v3725_v34  ;;  %v3817_v34 = vld [vmem:[%s5564_s1 + $0x8] ss:$48 sps:$4 sm:$0xff]  }
  0x2e   : > { %2533 = vmatpush2.bf16.msra.mxu1 %v3726_v35  ;;  %2491 = vmatprep.subr.bf16.mxu0 %v3727_v36  ;;  %v3820_v35 = vld [vmem:[%s5564_s1 + $0x608] ss:$48 sps:$4 sm:$0xff]   ;;  %v3825_v36 = vld [vmem:[%s5564_s1 + $0x5ac] ss:$48 sps:$4 sm:$0xff]  }
  0x2f   : > { %2534 = vmatprep.subr.bf16.mxu1 %v3729_v37  ;;  %v3828_v37 = vld [vmem:[%s5564_s1 + $0xbac] ss:$48 sps:$4 sm:$0xff]  }
  0x31   : > { %2492 = vmatpush2.bf16.msra.mxu0 %v3731_v38  ;;  %v3823_v38 = vld [vmem:[%s5564_s1 + $0x5a8] ss:$48 sps:$4 sm:$0xff]  }
  0x32   : > { %2535 = vmatpush2.bf16.msra.mxu1 %v3732_v39  ;;  %2493 = vmatprep.subr.bf16.mxu0 %v3733_v40  ;;  %v3826_v39 = vld [vmem:[%s5564_s1 + $0xba8] ss:$48 sps:$4 sm:$0xff]   ;;  %v3831_v40 = vld [vmem:[%s5564_s1 + $0x54c] ss:$48 sps:$4 sm:$0xff]  }
  0x33   : > { %2536 = vmatprep.subr.bf16.mxu1 %v3735_v41  ;;  %v3834_v41 = vld [vmem:[%s5564_s1 + $0xb4c] ss:$48 sps:$4 sm:$0xff]  }
  0x35   : > { %2494 = vmatpush2.bf16.msra.mxu0 %v3737_v42  ;;  %v3829_v42 = vld [vmem:[%s5564_s1 + $0x548] ss:$48 sps:$4 sm:$0xff]  }
  0x36   : > { %2537 = vmatpush2.bf16.msra.mxu1 %v3738_v43  ;;  %2495 = vmatprep.subr.bf16.mxu0 %v3739_v44  ;;  %v3832_v43 = vld [vmem:[%s5564_s1 + $0xb48] ss:$48 sps:$4 sm:$0xff]   ;;  %v3837_v44 = vld [vmem:[%s5564_s1 + $0x4ec] ss:$48 sps:$4 sm:$0xff]  }
  0x37   : > { %2538 = vmatprep.subr.bf16.mxu1 %v3741_v45  ;;  %v3840_v45 = vld [vmem:[%s5564_s1 + $0xaec] ss:$48 sps:$4 sm:$0xff]  }
  0x39   : > { %2496 = vmatpush2.bf16.msra.mxu0 %v3743_v46  ;;  %v3835_v46 = vld [vmem:[%s5564_s1 + $0x4e8] ss:$48 sps:$4 sm:$0xff]  }
  0x3a   : > { %2539 = vmatpush2.bf16.msra.mxu1 %v3744_v47  ;;  %2497 = vmatprep.subr.bf16.mxu0 %v3745_v49  ;;  %v3838_v47 = vld [vmem:[%s5564_s1 + $0xae8] ss:$48 sps:$4 sm:$0xff]   ;;  %v3843_v49 = vld [vmem:[%s5564_s1 + $0x48c] ss:$48 sps:$4 sm:$0xff]  }
  0x3b   : > { %2540 = vmatprep.subr.bf16.mxu1 %v3747_v51  ;;  %v3846_v51 = vld [vmem:[%s5564_s1 + $0xa8c] ss:$48 sps:$4 sm:$0xff]  }
  0x3d   : > { %2498 = vmatpush2.bf16.msra.mxu0 %v3749_v52  ;;  %v3841_v52 = vld [vmem:[%s5564_s1 + $0x488] ss:$48 sps:$4 sm:$0xff]  }
  0x3e   : > { %2541 = vmatpush2.bf16.msra.mxu1 %v3750_v53  ;;  %2499 = vmatprep.subr.bf16.mxu0 %v3751_v54  ;;  %v3844_v53 = vld [vmem:[%s5564_s1 + $0xa88] ss:$48 sps:$4 sm:$0xff]   ;;  %v3849_v54 = vld [vmem:[%s5564_s1 + $0x42c] ss:$48 sps:$4 sm:$0xff]  }
  0x3f   : > { %2542 = vmatprep.subr.bf16.mxu1 %v3753_v55  ;;  %v3852_v55 = vld [vmem:[%s5564_s1 + $0xa2c] ss:$48 sps:$4 sm:$0xff]  }
  0x41   : > { %2500 = vmatpush2.bf16.msra.mxu0 %v3755_v56  ;;  %v3847_v56 = vld [vmem:[%s5564_s1 + $0x428] ss:$48 sps:$4 sm:$0xff]  }
  0x42   : > { %2543 = vmatpush2.bf16.msra.mxu1 %v3756_v57  ;;  %2501 = vmatprep.subr.bf16.mxu0 %v3757_v58  ;;  %v3850_v57 = vld [vmem:[%s5564_s1 + $0xa28] ss:$48 sps:$4 sm:$0xff]   ;;  %v3855_v58 = vld [vmem:[%s5564_s1 + $0x3cc] ss:$48 sps:$4 sm:$0xff]  }
  0x43   : > { %2544 = vmatprep.subr.bf16.mxu1 %v3759_v59  ;;  %v3858_v59 = vld [vmem:[%s5564_s1 + $0x9cc] ss:$48 sps:$4 sm:$0xff]  }
  0x45   : > { %2502 = vmatpush2.bf16.msra.mxu0 %v3761_v60  ;;  %v3853_v60 = vld [vmem:[%s5564_s1 + $0x3c8] ss:$48 sps:$4 sm:$0xff]  }
  0x46   : > { %2545 = vmatpush2.bf16.msra.mxu1 %v3762_v61  ;;  %2503 = vmatprep.subr.bf16.mxu0 %v3763_v62  ;;  %v3856_v61 = vld [vmem:[%s5564_s1 + $0x9c8] ss:$48 sps:$4 sm:$0xff]   ;;  %v3861_v62 = vld [vmem:[%s5564_s1 + $0x36c] ss:$48 sps:$4 sm:$0xff]  }
  0x47   : > { %2546 = vmatprep.subr.bf16.mxu1 %v3765_v63  ;;  %v3864_v63 = vld [vmem:[%s5564_s1 + $0x96c] ss:$48 sps:$4 sm:$0xff]  }
  0x49   : > { %2504 = vmatpush2.bf16.msra.mxu0 %v3767_v0  ;;  %v3859_v0 = vld [vmem:[%s5564_s1 + $0x368] ss:$48 sps:$4 sm:$0xff]  }
  0x4a   : > { %2547 = vmatpush2.bf16.msra.mxu1 %v3768_v1  ;;  %2559 = vmatprep.subr.bf16.mxu0 %v3777_v2  ;;  %v3862_v1 = vld [vmem:[%s5564_s1 + $0x968] ss:$48 sps:$4 sm:$0xff]   ;;  %v3867_v2 = vld [vmem:[%s5564_s1 + $0x30c] ss:$48 sps:$4 sm:$0xff]  }
  0x4b   : > { %2602 = vmatprep.subr.bf16.mxu1 %v3780_v3  ;;  %v3870_v3 = vld [vmem:[%s5564_s1 + $0x90c] ss:$48 sps:$4 sm:$0xff]  }
  0x4c   : > { %2506 = vmatmul.mubr.bf16.vlgmr.msra.gmra.mxu0 %v4518_v4 }
  0x4d   : > { %2549 = vmatmul.mubr.bf16.vlgmr.msra.gmra.mxu1 %v4521_v5  ;;  %2560 = vmatpush1.bf16.msra.mxu0 %v3775_v6  ;;  %v3865_v6 = vld [vmem:[%s5564_s1 + $0x308] ss:$48 sps:$4 sm:$0xff]  }
  0x4e   : > { %2603 = vmatpush1.bf16.msra.mxu1 %v3778_v7  ;;  %2561 = vmatprep.subr.bf16.mxu0 %v3783_v8  ;;  %v3868_v7 = vld [vmem:[%s5564_s1 + $0x908] ss:$48 sps:$4 sm:$0xff]   ;;  %v3873_v8 = vld [vmem:[%s5564_s1 + $0x2b4] ss:$48 sps:$4 sm:$0xff]  }
  0x4f   : > { %2604 = vmatprep.subr.bf16.mxu1 %v3786_v9  ;;  %2591 = vmatprep.mubr.bf16.mxu0 %v4456_v48  ;;  %v3876_v9 = vld [vmem:[%s5564_s1 + $0x8b4] ss:$48 sps:$4 sm:$0xff]  }
  0x50   : > { %2634 = vmatprep.mubr.bf16.mxu1 %v4462_v50 }
  0x51   : > { %2562 = vmatpush1.bf16.msra.mxu0 %v3781_v10  ;;  %v3871_v10 = vld [vmem:[%s5564_s1 + $0x2b0] ss:$48 sps:$4 sm:$0xff]  }
  0x52   : > { %2605 = vmatpush1.bf16.msra.mxu1 %v3784_v11  ;;  %2563 = vmatprep.subr.bf16.mxu0 %v3789_v12  ;;  %v3874_v11 = vld [vmem:[%s5564_s1 + $0x8b0] ss:$48 sps:$4 sm:$0xff]   ;;  %v3879_v12 = vld [vmem:[%s5564_s1 + $0x254] ss:$48 sps:$4 sm:$0xff]  }
  0x53   : > { %2606 = vmatprep.subr.bf16.mxu1 %v3792_v13  ;;  %v3882_v13 = vld [vmem:[%s5564_s1 + $0x854] ss:$48 sps:$4 sm:$0xff]  }
  0x55   : > { %2564 = vmatpush1.bf16.msra.mxu0 %v3787_v14  ;;  %v3877_v14 = vld [vmem:[%s5564_s1 + $0x250] ss:$48 sps:$4 sm:$0xff]  }
  0x56   : > { %2607 = vmatpush1.bf16.msra.mxu1 %v3790_v15  ;;  %2565 = vmatprep.subr.bf16.mxu0 %v3795_v16  ;;  %v3880_v15 = vld [vmem:[%s5564_s1 + $0x850] ss:$48 sps:$4 sm:$0xff]   ;;  %v3885_v16 = vld [vmem:[%s5564_s1 + $0x1f4] ss:$48 sps:$4 sm:$0xff]  }
  0x57   : > { %2608 = vmatprep.subr.bf16.mxu1 %v3798_v17  ;;  %v3888_v17 = vld [vmem:[%s5564_s1 + $0x7f4] ss:$48 sps:$4 sm:$0xff]  }
  0x59   : > { %2566 = vmatpush1.bf16.msra.mxu0 %v3793_v18  ;;  %v3883_v18 = vld [vmem:[%s5564_s1 + $0x1f0] ss:$48 sps:$4 sm:$0xff]  }
  0x5a   : > { %2609 = vmatpush1.bf16.msra.mxu1 %v3796_v19  ;;  %2567 = vmatprep.subr.bf16.mxu0 %v3801_v20  ;;  %v3886_v19 = vld [vmem:[%s5564_s1 + $0x7f0] ss:$48 sps:$4 sm:$0xff]   ;;  %v3891_v20 = vld [vmem:[%s5564_s1 + $0x194] ss:$48 sps:$4 sm:$0xff]  }
  0x5b   : > { %2610 = vmatprep.subr.bf16.mxu1 %v3804_v21  ;;  %v3892_v21 = vld [vmem:[%s5564_s1 + $0x790] ss:$48 sps:$4 sm:$0xff]  }
  0x5d   : > { %2568 = vmatpush1.bf16.msra.mxu0 %v3799_v22  ;;  %v3897_v22 = vld [vmem:[%s5564_s1 + $0x134] ss:$48 sps:$4 sm:$0xff]  }
  0x5e   : > { %2611 = vmatpush1.bf16.msra.mxu1 %v3802_v23  ;;  %2569 = vmatprep.subr.bf16.mxu0 %v3807_v24  ;;  %v3900_v23 = vld [vmem:[%s5564_s1 + $0x734] ss:$48 sps:$4 sm:$0xff]   ;;  %v3895_v24 = vld [vmem:[%s5564_s1 + $0x130] ss:$48 sps:$4 sm:$0xff]  }
  0x5f   : > { %2612 = vmatprep.subr.bf16.mxu1 %v3810_v25  ;;  %v3898_v25 = vld [vmem:[%s5564_s1 + $0x730] ss:$48 sps:$4 sm:$0xff]  }
  0x61   : > { %2570 = vmatpush1.bf16.msra.mxu0 %v3805_v26  ;;  %v3903_v26 = vld [vmem:[%s5564_s1 + $0xd4] ss:$48 sps:$4 sm:$0xff]  }
  0x62   : > { %2613 = vmatpush1.bf16.msra.mxu1 %v3808_v27  ;;  %2571 = vmatprep.subr.bf16.mxu0 %v3813_v28  ;;  %v3906_v27 = vld [vmem:[%s5564_s1 + $0x6d4] ss:$48 sps:$4 sm:$0xff]   ;;  %v3901_v28 = vld [vmem:[%s5564_s1 + $0xd0] ss:$48 sps:$4 sm:$0xff]  }
  0x63   : > { %2614 = vmatprep.subr.bf16.mxu1 %v3816_v29  ;;  %v3904_v29 = vld [vmem:[%s5564_s1 + $0x6d0] ss:$48 sps:$4 sm:$0xff]  }
  0x65   : > { %2572 = vmatpush1.bf16.msra.mxu0 %v3811_v30  ;;  %v3909_v30 = vld [vmem:[%s5564_s1 + $0x74] ss:$48 sps:$4 sm:$0xff]  }
  0x66   : > { %2615 = vmatpush1.bf16.msra.mxu1 %v3814_v31  ;;  %2573 = vmatprep.subr.bf16.mxu0 %v3819_v32  ;;  %v3912_v31 = vld [vmem:[%s5564_s1 + $0x674] ss:$48 sps:$4 sm:$0xff]   ;;  %v3907_v32 = vld [vmem:[%s5564_s1 + $0x70] ss:$48 sps:$4 sm:$0xff]  }
  0x67   : > { %2616 = vmatprep.subr.bf16.mxu1 %v3822_v33  ;;  %v3910_v33 = vld [vmem:[%s5564_s1 + $0x670] ss:$48 sps:$4 sm:$0xff]  }
  0x69   : > { %2574 = vmatpush1.bf16.msra.mxu0 %v3817_v34  ;;  %v3915_v34 = vld [vmem:[%s5564_s1 + $0x14] ss:$48 sps:$4 sm:$0xff]  }
  0x6a   : > { %2617 = vmatpush1.bf16.msra.mxu1 %v3820_v35  ;;  %2575 = vmatprep.subr.bf16.mxu0 %v3825_v36  ;;  %v3918_v35 = vld [vmem:[%s5564_s1 + $0x614] ss:$48 sps:$4 sm:$0xff]   ;;  %v3913_v36 = vld [vmem:[%s5564_s1 + $0x10] ss:$48 sps:$4 sm:$0xff]  }
  0x6b   : > { %2618 = vmatprep.subr.bf16.mxu1 %v3828_v37  ;;  %v3916_v37 = vld [vmem:[%s5564_s1 + $0x610] ss:$48 sps:$4 sm:$0xff]  }
  0x6d   : > { %2576 = vmatpush2.bf16.msra.mxu0 %v3823_v38  ;;  %v3921_v38 = vld [vmem:[%s5564_s1 + $0x5b4] ss:$48 sps:$4 sm:$0xff]  }
  0x6e   : > { %2619 = vmatpush2.bf16.msra.mxu1 %v3826_v39  ;;  %2577 = vmatprep.subr.bf16.mxu0 %v3831_v40  ;;  %v3924_v39 = vld [vmem:[%s5564_s1 + $0xbb4] ss:$48 sps:$4 sm:$0xff]   ;;  %v3919_v40 = vld [vmem:[%s5564_s1 + $0x5b0] ss:$48 sps:$4 sm:$0xff]  }
  0x6f   : > { %2620 = vmatprep.subr.bf16.mxu1 %v3834_v41  ;;  %v3922_v41 = vld [vmem:[%s5564_s1 + $0xbb0] ss:$48 sps:$4 sm:$0xff]  }
  0x71   : > { %2578 = vmatpush2.bf16.msra.mxu0 %v3829_v42  ;;  %v3927_v42 = vld [vmem:[%s5564_s1 + $0x554] ss:$48 sps:$4 sm:$0xff]  }
  0x72   : > { %2621 = vmatpush2.bf16.msra.mxu1 %v3832_v43  ;;  %2579 = vmatprep.subr.bf16.mxu0 %v3837_v44  ;;  %v3930_v43 = vld [vmem:[%s5564_s1 + $0xb54] ss:$48 sps:$4 sm:$0xff]   ;;  %v3925_v44 = vld [vmem:[%s5564_s1 + $0x550] ss:$48 sps:$4 sm:$0xff]  }
  0x73   : > { %2622 = vmatprep.subr.bf16.mxu1 %v3840_v45  ;;  %v3928_v45 = vld [vmem:[%s5564_s1 + $0xb50] ss:$48 sps:$4 sm:$0xff]  }
  0x75   : > { %2580 = vmatpush2.bf16.msra.mxu0 %v3835_v46  ;;  %v3933_v46 = vld [vmem:[%s5564_s1 + $0x4f4] ss:$48 sps:$4 sm:$0xff]  }
  0x76   : > { %2623 = vmatpush2.bf16.msra.mxu1 %v3838_v47  ;;  %2581 = vmatprep.subr.bf16.mxu0 %v3843_v49  ;;  %v3936_v47 = vld [vmem:[%s5564_s1 + $0xaf4] ss:$48 sps:$4 sm:$0xff]   ;;  %v3931_v49 = vld [vmem:[%s5564_s1 + $0x4f0] ss:$48 sps:$4 sm:$0xff]  }
  0x77   : > { %2624 = vmatprep.subr.bf16.mxu1 %v3846_v51  ;;  %v3934_v51 = vld [vmem:[%s5564_s1 + $0xaf0] ss:$48 sps:$4 sm:$0xff]  }
  0x79   : > { %2582 = vmatpush2.bf16.msra.mxu0 %v3841_v52  ;;  %v3939_v52 = vld [vmem:[%s5564_s1 + $0x494] ss:$48 sps:$4 sm:$0xff]  }
  0x7a   : > { %2625 = vmatpush2.bf16.msra.mxu1 %v3844_v53  ;;  %2583 = vmatprep.subr.bf16.mxu0 %v3849_v54  ;;  %v3942_v53 = vld [vmem:[%s5564_s1 + $0xa94] ss:$48 sps:$4 sm:$0xff]   ;;  %v3937_v54 = vld [vmem:[%s5564_s1 + $0x490] ss:$48 sps:$4 sm:$0xff]  }
  0x7b   : > { %2626 = vmatprep.subr.bf16.mxu1 %v3852_v55  ;;  %v3940_v55 = vld [vmem:[%s5564_s1 + $0xa90] ss:$48 sps:$4 sm:$0xff]  }
  0x7d   : > { %2584 = vmatpush2.bf16.msra.mxu0 %v3847_v56  ;;  %v3945_v56 = vld [vmem:[%s5564_s1 + $0x434] ss:$48 sps:$4 sm:$0xff]  }
  0x7e   : > { %2627 = vmatpush2.bf16.msra.mxu1 %v3850_v57  ;;  %2585 = vmatprep.subr.bf16.mxu0 %v3855_v58  ;;  %v3948_v57 = vld [vmem:[%s5564_s1 + $0xa34] ss:$48 sps:$4 sm:$0xff]   ;;  %v3943_v58 = vld [vmem:[%s5564_s1 + $0x430] ss:$48 sps:$4 sm:$0xff]  }
  0x7f   : > { %2628 = vmatprep.subr.bf16.mxu1 %v3858_v59  ;;  %v3946_v59 = vld [vmem:[%s5564_s1 + $0xa30] ss:$48 sps:$4 sm:$0xff]  }
  0x81   : > { %2586 = vmatpush2.bf16.msra.mxu0 %v3853_v60  ;;  %v3951_v60 = vld [vmem:[%s5564_s1 + $0x3d4] ss:$48 sps:$4 sm:$0xff]  }
  0x82   : > { %2629 = vmatpush2.bf16.msra.mxu1 %v3856_v61  ;;  %2587 = vmatprep.subr.bf16.mxu0 %v3861_v62  ;;  %v3954_v61 = vld [vmem:[%s5564_s1 + $0x9d4] ss:$48 sps:$4 sm:$0xff]   ;;  %v3949_v62 = vld [vmem:[%s5564_s1 + $0x3d0] ss:$48 sps:$4 sm:$0xff]  }
  0x83   : > { %2630 = vmatprep.subr.bf16.mxu1 %v3864_v63  ;;  %v3952_v63 = vld [vmem:[%s5564_s1 + $0x9d0] ss:$48 sps:$4 sm:$0xff]  }
  0x85   : > { %2588 = vmatpush2.bf16.msra.mxu0 %v3859_v0  ;;  %v3957_v0 = vld [vmem:[%s5564_s1 + $0x374] ss:$48 sps:$4 sm:$0xff]  }
  0x86   : > { %2631 = vmatpush2.bf16.msra.mxu1 %v3862_v1  ;;  %2589 = vmatprep.subr.bf16.mxu0 %v3867_v2  ;;  %v3960_v1 = vld [vmem:[%s5564_s1 + $0x974] ss:$48 sps:$4 sm:$0xff]   ;;  %v3955_v2 = vld [vmem:[%s5564_s1 + $0x370] ss:$48 sps:$4 sm:$0xff]  }
  0x87   : > { %2632 = vmatprep.subr.bf16.mxu1 %v3870_v3  ;;  %v3958_v3 = vld [vmem:[%s5564_s1 + $0x970] ss:$48 sps:$4 sm:$0xff]  }
  0x89   : > { %2590 = vmatpush2.bf16.msra.mxu0 %v3865_v6  ;;  %v3963_v6 = vld [vmem:[%s5564_s1 + $0x314] ss:$48 sps:$4 sm:$0xff]  }
  0x8a   : > { %2633 = vmatpush2.bf16.msra.mxu1 %v3868_v7  ;;  %2645 = vmatprep.subr.bf16.mxu0 %v3873_v8  ;;  %v3966_v7 = vld [vmem:[%s5564_s1 + $0x914] ss:$48 sps:$4 sm:$0xff]   ;;  %v3961_v8 = vld [vmem:[%s5564_s1 + $0x310] ss:$48 sps:$4 sm:$0xff]  }
  0x8b   : > { %2688 = vmatprep.subr.bf16.mxu1 %v3876_v9  ;;  %v3964_v9 = vld [vmem:[%s5564_s1 + $0x910] ss:$48 sps:$4 sm:$0xff]  }
  0x8c   : > { %2592 = vmatmul.mubr.bf16.vlgmr.msra.gmra.mxu0 %v4518_v4 }
  0x8d   : > { %2635 = vmatmul.mubr.bf16.vlgmr.msra.gmra.mxu1 %v4521_v5  ;;  %2646 = vmatpush1.bf16.msra.mxu0 %v3871_v10  ;;  %v3969_v10 = vld [vmem:[%s5564_s1 + $0x2bc] ss:$48 sps:$4 sm:$0xff]  }
  0x8e   : > { %2689 = vmatpush1.bf16.msra.mxu1 %v3874_v11  ;;  %2647 = vmatprep.subr.bf16.mxu0 %v3879_v12  ;;  %v3972_v11 = vld [vmem:[%s5564_s1 + $0x8bc] ss:$48 sps:$4 sm:$0xff]   ;;  %v3967_v12 = vld [vmem:[%s5564_s1 + $0x2b8] ss:$48 sps:$4 sm:$0xff]  }
  0x8f   : > { %2690 = vmatprep.subr.bf16.mxu1 %v3882_v13  ;;  %2677 = vmatprep.mubr.bf16.mxu0 %v4456_v48  ;;  %v3894_v48 = vld [vmem:[%s5564_s1 + $0x794] ss:$48 sps:$4 sm:$0xff]   ;;  %v3970_v13 = vld [vmem:[%s5564_s1 + $0x8b8] ss:$48 sps:$4 sm:$0xff]  }
  0x90   : > { %2720 = vmatprep.mubr.bf16.mxu1 %v4462_v50  ;;  %v3889_v50 = vld [vmem:[%s5564_s1 + $0x190] ss:$48 sps:$4 sm:$0xff]  }
  0x91   : > { %2648 = vmatpush1.bf16.msra.mxu0 %v3877_v14  ;;  %v3975_v14 = vld [vmem:[%s5564_s1 + $0x25c] ss:$48 sps:$4 sm:$0xff]  }
  0x92   : > { %2691 = vmatpush1.bf16.msra.mxu1 %v3880_v15  ;;  %2649 = vmatprep.subr.bf16.mxu0 %v3885_v16  ;;  %v3978_v15 = vld [vmem:[%s5564_s1 + $0x85c] ss:$48 sps:$4 sm:$0xff]   ;;  %v3973_v16 = vld [vmem:[%s5564_s1 + $0x258] ss:$48 sps:$4 sm:$0xff]  }
  0x93   : > { %2692 = vmatprep.subr.bf16.mxu1 %v3888_v17  ;;  %v3976_v17 = vld [vmem:[%s5564_s1 + $0x858] ss:$48 sps:$4 sm:$0xff]  }
  0x95   : > { %2650 = vmatpush1.bf16.msra.mxu0 %v3883_v18  ;;  %v3981_v18 = vld [vmem:[%s5564_s1 + $0x1fc] ss:$48 sps:$4 sm:$0xff]  }
  0x96   : > { %2693 = vmatpush1.bf16.msra.mxu1 %v3886_v19  ;;  %2651 = vmatprep.subr.bf16.mxu0 %v3891_v20  ;;  %v4946_v19 = vld [vmem:[%s4444_s26 + $0xc] ss:$16 sps:$4 sm:$0xff]   ;;  %v3979_v20 = vld [vmem:[%s5564_s1 + $0x1f8] ss:$48 sps:$4 sm:$0xff]  }
  0x97   : > { %2694 = vmatprep.subr.bf16.mxu1 %v3894_v48  ;;  %v3982_v48 = vld [vmem:[%s5564_s1 + $0x7f8] ss:$48 sps:$4 sm:$0xff]  }
  0x99   : > { %2652 = vmatpush1.bf16.msra.mxu0 %v3889_v50  ;;  %v3987_v50 = vld [vmem:[%s5564_s1 + $0x19c] ss:$48 sps:$4 sm:$0xff]  }
  0x9a   : > { %2695 = vmatpush1.bf16.msra.mxu1 %v3892_v21  ;;  %2653 = vmatprep.subr.bf16.mxu0 %v3897_v22  ;;  %v3990_v21 = vld [vmem:[%s5564_s1 + $0x79c] ss:$48 sps:$4 sm:$0xff]   ;;  %v3985_v22 = vld [vmem:[%s5564_s1 + $0x198] ss:$48 sps:$4 sm:$0xff]  }
  0x9b   : > { %2696 = vmatprep.subr.bf16.mxu1 %v3900_v23  ;;  %v3988_v23 = vld [vmem:[%s5564_s1 + $0x798] ss:$48 sps:$4 sm:$0xff]  }
  0x9d   : > { %2654 = vmatpush1.bf16.msra.mxu0 %v3895_v24  ;;  %v3993_v24 = vld [vmem:[%s5564_s1 + $0x13c] ss:$48 sps:$4 sm:$0xff]  }
  0x9e   : > { %2697 = vmatpush1.bf16.msra.mxu1 %v3898_v25  ;;  %2655 = vmatprep.subr.bf16.mxu0 %v3903_v26  ;;  %v3996_v25 = vld [vmem:[%s5564_s1 + $0x73c] ss:$48 sps:$4 sm:$0xff]   ;;  %v3991_v26 = vld [vmem:[%s5564_s1 + $0x138] ss:$48 sps:$4 sm:$0xff]  }
  0x9f   : > { %2698 = vmatprep.subr.bf16.mxu1 %v3906_v27  ;;  %v3994_v27 = vld [vmem:[%s5564_s1 + $0x738] ss:$48 sps:$4 sm:$0xff]  }
  0xa1   : > { %2656 = vmatpush1.bf16.msra.mxu0 %v3901_v28  ;;  %v3999_v28 = vld [vmem:[%s5564_s1 + $0xdc] ss:$48 sps:$4 sm:$0xff]  }
  0xa2   : > { %2699 = vmatpush1.bf16.msra.mxu1 %v3904_v29  ;;  %2657 = vmatprep.subr.bf16.mxu0 %v3909_v30  ;;  %v4002_v29 = vld [vmem:[%s5564_s1 + $0x6dc] ss:$48 sps:$4 sm:$0xff]   ;;  %v3997_v30 = vld [vmem:[%s5564_s1 + $0xd8] ss:$48 sps:$4 sm:$0xff]  }
  0xa3   : > { %2700 = vmatprep.subr.bf16.mxu1 %v3912_v31  ;;  %v4000_v31 = vld [vmem:[%s5564_s1 + $0x6d8] ss:$48 sps:$4 sm:$0xff]  }
  0xa5   : > { %2658 = vmatpush1.bf16.msra.mxu0 %v3907_v32  ;;  %v4005_v32 = vld [vmem:[%s5564_s1 + $0x7c] ss:$48 sps:$4 sm:$0xff]  }
  0xa6   : > { %2701 = vmatpush1.bf16.msra.mxu1 %v3910_v33  ;;  %2659 = vmatprep.subr.bf16.mxu0 %v3915_v34  ;;  %v4008_v33 = vld [vmem:[%s5564_s1 + $0x67c] ss:$48 sps:$4 sm:$0xff]   ;;  %v4003_v34 = vld [vmem:[%s5564_s1 + $0x78] ss:$48 sps:$4 sm:$0xff]  }
  0xa7   : > { %2702 = vmatprep.subr.bf16.mxu1 %v3918_v35  ;;  %v4006_v35 = vld [vmem:[%s5564_s1 + $0x678] ss:$48 sps:$4 sm:$0xff]  }
  0xa9   : > { %2660 = vmatpush1.bf16.msra.mxu0 %v3913_v36  ;;  %v4011_v36 = vld [vmem:[%s5564_s1 + $0x1c] ss:$48 sps:$4 sm:$0xff]  }
  0xaa   : > { %2703 = vmatpush1.bf16.msra.mxu1 %v3916_v37  ;;  %2661 = vmatprep.subr.bf16.mxu0 %v3921_v38  ;;  %v4014_v37 = vld [vmem:[%s5564_s1 + $0x61c] ss:$48 sps:$4 sm:$0xff]   ;;  %v4009_v38 = vld [vmem:[%s5564_s1 + $0x18] ss:$48 sps:$4 sm:$0xff]  }
  0xab   : > { %2704 = vmatprep.subr.bf16.mxu1 %v3924_v39  ;;  %v4012_v39 = vld [vmem:[%s5564_s1 + $0x618] ss:$48 sps:$4 sm:$0xff]  }
  0xad   : > { %2662 = vmatpush2.bf16.msra.mxu0 %v3919_v40  ;;  %v4017_v40 = vld [vmem:[%s5564_s1 + $0x5bc] ss:$48 sps:$4 sm:$0xff]  }
  0xae   : > { %2705 = vmatpush2.bf16.msra.mxu1 %v3922_v41  ;;  %2663 = vmatprep.subr.bf16.mxu0 %v3927_v42  ;;  %v4020_v41 = vld [vmem:[%s5564_s1 + $0xbbc] ss:$48 sps:$4 sm:$0xff]   ;;  %v4015_v42 = vld [vmem:[%s5564_s1 + $0x5b8] ss:$48 sps:$4 sm:$0xff]  }
  0xaf   : > { %2706 = vmatprep.subr.bf16.mxu1 %v3930_v43  ;;  %v4018_v43 = vld [vmem:[%s5564_s1 + $0xbb8] ss:$48 sps:$4 sm:$0xff]  }
  0xb1   : > { %2664 = vmatpush2.bf16.msra.mxu0 %v3925_v44  ;;  %v4023_v44 = vld [vmem:[%s5564_s1 + $0x55c] ss:$48 sps:$4 sm:$0xff]  }
  0xb2   : > { %2707 = vmatpush2.bf16.msra.mxu1 %v3928_v45  ;;  %2665 = vmatprep.subr.bf16.mxu0 %v3933_v46  ;;  %v4026_v45 = vld [vmem:[%s5564_s1 + $0xb5c] ss:$48 sps:$4 sm:$0xff]   ;;  %v4021_v46 = vld [vmem:[%s5564_s1 + $0x558] ss:$48 sps:$4 sm:$0xff]  }
  0xb3   : > { %2708 = vmatprep.subr.bf16.mxu1 %v3936_v47  ;;  %v4024_v47 = vld [vmem:[%s5564_s1 + $0xb58] ss:$48 sps:$4 sm:$0xff]  }
  0xb5   : > { %2666 = vmatpush2.bf16.msra.mxu0 %v3931_v49  ;;  %v4029_v49 = vld [vmem:[%s5564_s1 + $0x4fc] ss:$48 sps:$4 sm:$0xff]  }
  0xb6   : > { %2709 = vmatpush2.bf16.msra.mxu1 %v3934_v51  ;;  %2667 = vmatprep.subr.bf16.mxu0 %v3939_v52  ;;  %v4032_v51 = vld [vmem:[%s5564_s1 + $0xafc] ss:$48 sps:$4 sm:$0xff]   ;;  %v4027_v52 = vld [vmem:[%s5564_s1 + $0x4f8] ss:$48 sps:$4 sm:$0xff]  }
  0xb7   : > { %2710 = vmatprep.subr.bf16.mxu1 %v3942_v53  ;;  %v4030_v53 = vld [vmem:[%s5564_s1 + $0xaf8] ss:$48 sps:$4 sm:$0xff]  }
  0xb9   : > { %2668 = vmatpush2.bf16.msra.mxu0 %v3937_v54  ;;  %v4035_v54 = vld [vmem:[%s5564_s1 + $0x49c] ss:$48 sps:$4 sm:$0xff]  }
  0xba   : > { %2711 = vmatpush2.bf16.msra.mxu1 %v3940_v55  ;;  %2669 = vmatprep.subr.bf16.mxu0 %v3945_v56  ;;  %v4038_v55 = vld [vmem:[%s5564_s1 + $0xa9c] ss:$48 sps:$4 sm:$0xff]   ;;  %v4033_v56 = vld [vmem:[%s5564_s1 + $0x498] ss:$48 sps:$4 sm:$0xff]  }
  0xbb   : > { %2712 = vmatprep.subr.bf16.mxu1 %v3948_v57  ;;  %v4036_v57 = vld [vmem:[%s5564_s1 + $0xa98] ss:$48 sps:$4 sm:$0xff]  }
  0xbd   : > { %2670 = vmatpush2.bf16.msra.mxu0 %v3943_v58  ;;  %v4041_v58 = vld [vmem:[%s5564_s1 + $0x43c] ss:$48 sps:$4 sm:$0xff]  }
  0xbe   : > { %2713 = vmatpush2.bf16.msra.mxu1 %v3946_v59  ;;  %2671 = vmatprep.subr.bf16.mxu0 %v3951_v60  ;;  %v4044_v59 = vld [vmem:[%s5564_s1 + $0xa3c] ss:$48 sps:$4 sm:$0xff]   ;;  %v4039_v60 = vld [vmem:[%s5564_s1 + $0x438] ss:$48 sps:$4 sm:$0xff]  }
  0xbf   : > { %2714 = vmatprep.subr.bf16.mxu1 %v3954_v61  ;;  %v4042_v61 = vld [vmem:[%s5564_s1 + $0xa38] ss:$48 sps:$4 sm:$0xff]  }
  0xc1   : > { %2672 = vmatpush2.bf16.msra.mxu0 %v3949_v62  ;;  %v4047_v62 = vld [vmem:[%s5564_s1 + $0x3dc] ss:$48 sps:$4 sm:$0xff]  }
  0xc2   : > { %2715 = vmatpush2.bf16.msra.mxu1 %v3952_v63  ;;  %2673 = vmatprep.subr.bf16.mxu0 %v3957_v0  ;;  %v4050_v63 = vld [vmem:[%s5564_s1 + $0x9dc] ss:$48 sps:$4 sm:$0xff]   ;;  %v4045_v0 = vld [vmem:[%s5564_s1 + $0x3d8] ss:$48 sps:$4 sm:$0xff]  }
  0xc3   : > { %2716 = vmatprep.subr.bf16.mxu1 %v3960_v1  ;;  %v4048_v1 = vld [vmem:[%s5564_s1 + $0x9d8] ss:$48 sps:$4 sm:$0xff]  }
  0xc5   : > { %2674 = vmatpush2.bf16.msra.mxu0 %v3955_v2  ;;  %v4053_v2 = vld [vmem:[%s5564_s1 + $0x37c] ss:$48 sps:$4 sm:$0xff]  }
  0xc6   : > { %2717 = vmatpush2.bf16.msra.mxu1 %v3958_v3  ;;  %2675 = vmatprep.subr.bf16.mxu0 %v3963_v6  ;;  %v4056_v3 = vld [vmem:[%s5564_s1 + $0x97c] ss:$48 sps:$4 sm:$0xff]   ;;  %v4051_v6 = vld [vmem:[%s5564_s1 + $0x378] ss:$48 sps:$4 sm:$0xff]  }
  0xc7   : > { %2718 = vmatprep.subr.bf16.mxu1 %v3966_v7  ;;  %v4054_v7 = vld [vmem:[%s5564_s1 + $0x978] ss:$48 sps:$4 sm:$0xff]  }
  0xc9   : > { %2676 = vmatpush2.bf16.msra.mxu0 %v3961_v8  ;;  %v4059_v8 = vld [vmem:[%s5564_s1 + $0x31c] ss:$48 sps:$4 sm:$0xff]  }
  0xca   : > { %2719 = vmatpush2.bf16.msra.mxu1 %v3964_v9  ;;  %2731 = vmatprep.subr.bf16.mxu0 %v3969_v10  ;;  %v4062_v9 = vld [vmem:[%s5564_s1 + $0x91c] ss:$48 sps:$4 sm:$0xff]   ;;  %v4057_v10 = vld [vmem:[%s5564_s1 + $0x318] ss:$48 sps:$4 sm:$0xff]  }
  0xcb   : > { %2774 = vmatprep.subr.bf16.mxu1 %v3972_v11  ;;  %v4060_v11 = vld [vmem:[%s5564_s1 + $0x918] ss:$48 sps:$4 sm:$0xff]  }
  0xcc   : > { %2678 = vmatmul.mubr.bf16.vlgmr.msra.gmra.mxu0 %v4518_v4  ;;  %v3984_v4 = vld [vmem:[%s5564_s1 + $0x7fc] ss:$48 sps:$4 sm:$0xff]  }
  0xcd   : > { %2721 = vmatmul.mubr.bf16.vlgmr.msra.gmra.mxu1 %v4521_v5  ;;  %2732 = vmatpush1.bf16.msra.mxu0 %v3967_v12  ;;  %v4942_v5 = vld [vmem:[%s4444_s26 + $0x4] ss:$16 sps:$4 sm:$0xff]  }
  0xce   : > { %2775 = vmatpush1.bf16.msra.mxu1 %v3970_v13  ;;  %2733 = vmatprep.subr.bf16.mxu0 %v3975_v14  ;;  %v4065_v12 = vld [vmem:[%s5564_s1 + $0x2c4] ss:$48 sps:$4 sm:$0xff]   ;;  %v4063_v14 = vld [vmem:[%s5564_s1 + $0x2c0] ss:$48 sps:$4 sm:$0xff]  }
  0xcf   : > { %2776 = vmatprep.subr.bf16.mxu1 %v3978_v15  ;;  %2763 = vmatprep.mubr.bf16.mxu0 %v4942_v5  ;;  %v4068_v13 = vld [vmem:[%s5564_s1 + $0x8c4] ss:$48 sps:$4 sm:$0xff]   ;;  %v4066_v15 = vld [vmem:[%s5564_s1 + $0x8c0] ss:$48 sps:$4 sm:$0xff]  }
  0xd0   : > { %2806 = vmatprep.mubr.bf16.mxu1 %v4946_v19 }
  0xd1   : > { %2734 = vmatpush1.bf16.msra.mxu0 %v3973_v16  ;;  %v4071_v16 = vld [vmem:[%s5564_s1 + $0x264] ss:$48 sps:$4 sm:$0xff]  }
  0xd2   : > { %2777 = vmatpush1.bf16.msra.mxu1 %v3976_v17  ;;  %2735 = vmatprep.subr.bf16.mxu0 %v3981_v18  ;;  %v4074_v17 = vld [vmem:[%s5564_s1 + $0x864] ss:$48 sps:$4 sm:$0xff]   ;;  %v5130_v18 = vld [vmem:[%s4444_s26] ss:$16 sps:$4 sm:$0xff]  }
  0xd3   : > { %2778 = vmatprep.subr.bf16.mxu1 %v3984_v4  ;;  %v5134_v4 = vld [vmem:[%s4444_s26 + $0x8] ss:$16 sps:$4 sm:$0xff]  }
  0xd5   : > { %2736 = vmatpush1.bf16.msra.mxu0 %v3979_v20  ;;  %v4069_v20 = vld [vmem:[%s5564_s1 + $0x260] ss:$48 sps:$4 sm:$0xff]  }
  0xd6   : > { %2779 = vmatpush1.bf16.msra.mxu1 %v3982_v48  ;;  %2737 = vmatprep.subr.bf16.mxu0 %v3987_v50  ;;  %v4072_v48 = vld [vmem:[%s5564_s1 + $0x860] ss:$48 sps:$4 sm:$0xff]   ;;  %v4077_v50 = vld [vmem:[%s5564_s1 + $0x204] ss:$48 sps:$4 sm:$0xff]  }
  0xd7   : > { %2780 = vmatprep.subr.bf16.mxu1 %v3990_v21  ;;  %v4080_v21 = vld [vmem:[%s5564_s1 + $0x804] ss:$48 sps:$4 sm:$0xff]  }
  0xd9   : > { %2738 = vmatpush1.bf16.msra.mxu0 %v3985_v22  ;;  %v4075_v22 = vld [vmem:[%s5564_s1 + $0x200] ss:$48 sps:$4 sm:$0xff]  }
  0xda   : > { %2781 = vmatpush1.bf16.msra.mxu1 %v3988_v23  ;;  %2739 = vmatprep.subr.bf16.mxu0 %v3993_v24  ;;  %v4078_v23 = vld [vmem:[%s5564_s1 + $0x800] ss:$48 sps:$4 sm:$0xff]   ;;  %v4083_v24 = vld [vmem:[%s5564_s1 + $0x1a4] ss:$48 sps:$4 sm:$0xff]  }
  0xdb   : > { %2782 = vmatprep.subr.bf16.mxu1 %v3996_v25  ;;  %v4086_v25 = vld [vmem:[%s5564_s1 + $0x7a4] ss:$48 sps:$4 sm:$0xff]  }
  0xdd   : > { %2740 = vmatpush1.bf16.msra.mxu0 %v3991_v26  ;;  %v4081_v26 = vld [vmem:[%s5564_s1 + $0x1a0] ss:$48 sps:$4 sm:$0xff]  }
  0xde   : > { %2783 = vmatpush1.bf16.msra.mxu1 %v3994_v27  ;;  %2741 = vmatprep.subr.bf16.mxu0 %v3999_v28  ;;  %v4084_v27 = vld [vmem:[%s5564_s1 + $0x7a0] ss:$48 sps:$4 sm:$0xff]   ;;  %v4089_v28 = vld [vmem:[%s5564_s1 + $0x144] ss:$48 sps:$4 sm:$0xff]  }
  0xdf   : > { %2784 = vmatprep.subr.bf16.mxu1 %v4002_v29  ;;  %v4092_v29 = vld [vmem:[%s5564_s1 + $0x744] ss:$48 sps:$4 sm:$0xff]  }
  0xe1   : > { %2742 = vmatpush1.bf16.msra.mxu0 %v3997_v30  ;;  %v4087_v30 = vld [vmem:[%s5564_s1 + $0x140] ss:$48 sps:$4 sm:$0xff]  }
  0xe2   : > { %2785 = vmatpush1.bf16.msra.mxu1 %v4000_v31  ;;  %2743 = vmatprep.subr.bf16.mxu0 %v4005_v32  ;;  %v4090_v31 = vld [vmem:[%s5564_s1 + $0x740] ss:$48 sps:$4 sm:$0xff]   ;;  %v4095_v32 = vld [vmem:[%s5564_s1 + $0xe4] ss:$48 sps:$4 sm:$0xff]  }
  0xe3   : > { %2786 = vmatprep.subr.bf16.mxu1 %v4008_v33  ;;  %v4098_v33 = vld [vmem:[%s5564_s1 + $0x6e4] ss:$48 sps:$4 sm:$0xff]  }
  0xe5   : > { %2744 = vmatpush1.bf16.msra.mxu0 %v4003_v34  ;;  %v4093_v34 = vld [vmem:[%s5564_s1 + $0xe0] ss:$48 sps:$4 sm:$0xff]  }
  0xe6   : > { %2787 = vmatpush1.bf16.msra.mxu1 %v4006_v35  ;;  %2745 = vmatprep.subr.bf16.mxu0 %v4011_v36  ;;  %v4096_v35 = vld [vmem:[%s5564_s1 + $0x6e0] ss:$48 sps:$4 sm:$0xff]   ;;  %v4101_v36 = vld [vmem:[%s5564_s1 + $0x84] ss:$48 sps:$4 sm:$0xff]  }
  0xe7   : > { %2788 = vmatprep.subr.bf16.mxu1 %v4014_v37  ;;  %v4104_v37 = vld [vmem:[%s5564_s1 + $0x684] ss:$48 sps:$4 sm:$0xff]  }
  0xe9   : > { %2746 = vmatpush1.bf16.msra.mxu0 %v4009_v38  ;;  %v4099_v38 = vld [vmem:[%s5564_s1 + $0x80] ss:$48 sps:$4 sm:$0xff]  }
  0xea   : > { %2789 = vmatpush1.bf16.msra.mxu1 %v4012_v39  ;;  %2747 = vmatprep.subr.bf16.mxu0 %v4017_v40  ;;  %v4102_v39 = vld [vmem:[%s5564_s1 + $0x680] ss:$48 sps:$4 sm:$0xff]   ;;  %v4107_v40 = vld [vmem:[%s5564_s1 + $0x24] ss:$48 sps:$4 sm:$0xff]  }
  0xeb   : > { %2790 = vmatprep.subr.bf16.mxu1 %v4020_v41  ;;  %v4110_v41 = vld [vmem:[%s5564_s1 + $0x624] ss:$48 sps:$4 sm:$0xff]  }
  0xed   : > { %2748 = vmatpush2.bf16.msra.mxu0 %v4015_v42  ;;  %v4105_v42 = vld [vmem:[%s5564_s1 + $0x20] ss:$48 sps:$4 sm:$0xff]  }
  0xee   : > { %2791 = vmatpush2.bf16.msra.mxu1 %v4018_v43  ;;  %2749 = vmatprep.subr.bf16.mxu0 %v4023_v44  ;;  %v4108_v43 = vld [vmem:[%s5564_s1 + $0x620] ss:$48 sps:$4 sm:$0xff]   ;;  %v4113_v44 = vld [vmem:[%s5564_s1 + $0x5c4] ss:$48 sps:$4 sm:$0xff]  }
  0xef   : > { %2792 = vmatprep.subr.bf16.mxu1 %v4026_v45  ;;  %v4116_v45 = vld [vmem:[%s5564_s1 + $0xbc4] ss:$48 sps:$4 sm:$0xff]  }
  0xf1   : > { %2750 = vmatpush2.bf16.msra.mxu0 %v4021_v46  ;;  %v4111_v46 = vld [vmem:[%s5564_s1 + $0x5c0] ss:$48 sps:$4 sm:$0xff]  }
  0xf2   : > { %2793 = vmatpush2.bf16.msra.mxu1 %v4024_v47  ;;  %2751 = vmatprep.subr.bf16.mxu0 %v4029_v49  ;;  %v4114_v47 = vld [vmem:[%s5564_s1 + $0xbc0] ss:$48 sps:$4 sm:$0xff]   ;;  %v4119_v49 = vld [vmem:[%s5564_s1 + $0x564] ss:$48 sps:$4 sm:$0xff]  }
  0xf3   : > { %2794 = vmatprep.subr.bf16.mxu1 %v4032_v51  ;;  %v4122_v51 = vld [vmem:[%s5564_s1 + $0xb64] ss:$48 sps:$4 sm:$0xff]  }
  0xf5   : > { %2752 = vmatpush2.bf16.msra.mxu0 %v4027_v52  ;;  %v4117_v52 = vld [vmem:[%s5564_s1 + $0x560] ss:$48 sps:$4 sm:$0xff]  }
  0xf6   : > { %2795 = vmatpush2.bf16.msra.mxu1 %v4030_v53  ;;  %2753 = vmatprep.subr.bf16.mxu0 %v4035_v54  ;;  %v4120_v53 = vld [vmem:[%s5564_s1 + $0xb60] ss:$48 sps:$4 sm:$0xff]   ;;  %v4125_v54 = vld [vmem:[%s5564_s1 + $0x504] ss:$48 sps:$4 sm:$0xff]  }
  0xf7   : > { %2796 = vmatprep.subr.bf16.mxu1 %v4038_v55  ;;  %v4128_v55 = vld [vmem:[%s5564_s1 + $0xb04] ss:$48 sps:$4 sm:$0xff]  }
  0xf9   : > { %2754 = vmatpush2.bf16.msra.mxu0 %v4033_v56  ;;  %v4123_v56 = vld [vmem:[%s5564_s1 + $0x500] ss:$48 sps:$4 sm:$0xff]  }
  0xfa   : > { %2797 = vmatpush2.bf16.msra.mxu1 %v4036_v57  ;;  %2755 = vmatprep.subr.bf16.mxu0 %v4041_v58  ;;  %v4126_v57 = vld [vmem:[%s5564_s1 + $0xb00] ss:$48 sps:$4 sm:$0xff]   ;;  %v4131_v58 = vld [vmem:[%s5564_s1 + $0x4a4] ss:$48 sps:$4 sm:$0xff]  }
  0xfb   : > { %2798 = vmatprep.subr.bf16.mxu1 %v4044_v59  ;;  %v4134_v59 = vld [vmem:[%s5564_s1 + $0xaa4] ss:$48 sps:$4 sm:$0xff]  }
  0xfd   : > { %2756 = vmatpush2.bf16.msra.mxu0 %v4039_v60  ;;  %v4129_v60 = vld [vmem:[%s5564_s1 + $0x4a0] ss:$48 sps:$4 sm:$0xff]  }
  0xfe   : > { %2799 = vmatpush2.bf16.msra.mxu1 %v4042_v61  ;;  %2757 = vmatprep.subr.bf16.mxu0 %v4047_v62  ;;  %v4132_v61 = vld [vmem:[%s5564_s1 + $0xaa0] ss:$48 sps:$4 sm:$0xff]   ;;  %v4137_v62 = vld [vmem:[%s5564_s1 + $0x444] ss:$48 sps:$4 sm:$0xff]  }
  0xff   : > { %2800 = vmatprep.subr.bf16.mxu1 %v4050_v63  ;;  %v4140_v63 = vld [vmem:[%s5564_s1 + $0xa44] ss:$48 sps:$4 sm:$0xff]  }
 0x101   : > { %2758 = vmatpush2.bf16.msra.mxu0 %v4045_v0  ;;  %v4135_v0 = vld [vmem:[%s5564_s1 + $0x440] ss:$48 sps:$4 sm:$0xff]  }
 0x102   : > { %2801 = vmatpush2.bf16.msra.mxu1 %v4048_v1  ;;  %2759 = vmatprep.subr.bf16.mxu0 %v4053_v2  ;;  %v4138_v1 = vld [vmem:[%s5564_s1 + $0xa40] ss:$48 sps:$4 sm:$0xff]   ;;  %v4143_v2 = vld [vmem:[%s5564_s1 + $0x3e4] ss:$48 sps:$4 sm:$0xff]  }
 0x103   : > { %2802 = vmatprep.subr.bf16.mxu1 %v4056_v3  ;;  %v4146_v3 = vld [vmem:[%s5564_s1 + $0x9e4] ss:$48 sps:$4 sm:$0xff]  }
 0x105   : > { %2760 = vmatpush2.bf16.msra.mxu0 %v4051_v6  ;;  %v4141_v6 = vld [vmem:[%s5564_s1 + $0x3e0] ss:$48 sps:$4 sm:$0xff]  }
 0x106   : > { %2803 = vmatpush2.bf16.msra.mxu1 %v4054_v7  ;;  %2761 = vmatprep.subr.bf16.mxu0 %v4059_v8  ;;  %v4144_v7 = vld [vmem:[%s5564_s1 + $0x9e0] ss:$48 sps:$4 sm:$0xff]  }
 0x107   : > { %2804 = vmatprep.subr.bf16.mxu1 %v4062_v9 }
 0x109   : > { %2762 = vmatpush2.bf16.msra.mxu0 %v4057_v10  ;;  %v4149_v10 = vld [vmem:[%s5564_s1 + $0x384] ss:$48 sps:$4 sm:$0xff]  }
 0x10a   : > { %2805 = vmatpush2.bf16.msra.mxu1 %v4060_v11  ;;  %2817 = vmatprep.subr.bf16.mxu0 %v4065_v12  ;;  %v4152_v11 = vld [vmem:[%s5564_s1 + $0x984] ss:$48 sps:$4 sm:$0xff]   ;;  %v4147_v12 = vld [vmem:[%s5564_s1 + $0x380] ss:$48 sps:$4 sm:$0xff]  }
 0x10b   : > { %2860 = vmatprep.subr.bf16.mxu1 %v4068_v13  ;;  %v4150_v13 = vld [vmem:[%s5564_s1 + $0x980] ss:$48 sps:$4 sm:$0xff]  }
 0x10c   : > { %2764 = vmatmul.mubr.bf16.vlgmr.msra.gmra.mxu0 %v5130_v18  ;;  %v5289_v8 = vpop.f32.mrf.mxu0 }
 0x10d   : > { %2807 = vmatmul.mubr.bf16.vlgmr.msra.gmra.mxu1 %v5134_v4  ;;  %2818 = vmatpush1.bf16.msra.mxu0 %v4063_v14  ;;  %v5291_v9 = vpop.f32.mrf.mxu1 }
 0x10e   : > { %2861 = vmatpush1.bf16.msra.mxu1 %v4066_v15  ;;  %2819 = vmatprep.subr.bf16.mxu0 %v4071_v16  ;;  %v5305_v14 = vpop.f32.mrf.mxu0  ;;  %v4155_v16 = vld [vmem:[%s5564_s1 + $0x324] ss:$48 sps:$4 sm:$0xff]  }
 0x10f   : > { %2862 = vmatprep.subr.bf16.mxu1 %v4074_v17  ;;  %2849 = vmatprep.mubr.bf16.mxu0 %v4942_v5  ;;  %v5307_v15 = vpop.f32.mrf.mxu1  ;;  %v4158_v17 = vld [vmem:[%s5564_s1 + $0x924] ss:$48 sps:$4 sm:$0xff]  }
 0x110   : > { %2892 = vmatprep.mubr.bf16.mxu1 %v4946_v19 }
 0x111   : > { %2820 = vmatpush1.bf16.msra.mxu0 %v4069_v20  ;;  %v4153_v20 = vld [vmem:[%s5564_s1 + $0x320] ss:$48 sps:$4 sm:$0xff]  }
 0x112   : > { %2863 = vmatpush1.bf16.msra.mxu1 %v4072_v48  ;;  %2821 = vmatprep.subr.bf16.mxu0 %v4077_v50  ;;  %v4156_v48 = vld [vmem:[%s5564_s1 + $0x920] ss:$48 sps:$4 sm:$0xff]   ;;  %v5321_v50 = vpop.f32.mrf.mxu0 }
 0x113   : > { %2864 = vmatprep.subr.bf16.mxu1 %v4080_v21  ;;  %v5323_v21 = vpop.f32.mrf.mxu1 }
 0x115   : > { %2822 = vmatpush1.bf16.msra.mxu0 %v4075_v22  ;;  %v4161_v22 = vld [vmem:[%s5564_s1 + $0x2cc] ss:$48 sps:$4 sm:$0xff]  }
 0x116   : > { %2865 = vmatpush1.bf16.msra.mxu1 %v4078_v23  ;;  %2823 = vmatprep.subr.bf16.mxu0 %v4083_v24  ;;  %v4164_v23 = vld [vmem:[%s5564_s1 + $0x8cc] ss:$48 sps:$4 sm:$0xff]   ;;  %v4159_v24 = vld [vmem:[%s5564_s1 + $0x2c8] ss:$48 sps:$4 sm:$0xff]  }
 0x117   : > { %2866 = vmatprep.subr.bf16.mxu1 %v4086_v25  ;;  %v4162_v25 = vld [vmem:[%s5564_s1 + $0x8c8] ss:$48 sps:$4 sm:$0xff]  }
 0x119   : > { %2824 = vmatpush1.bf16.msra.mxu0 %v4081_v26  ;;  %v5337_v26 = vpop.f32.mrf.mxu0 }
 0x11a   : > { %2867 = vmatpush1.bf16.msra.mxu1 %v4084_v27  ;;  %2825 = vmatprep.subr.bf16.mxu0 %v4089_v28  ;;  %v5339_v27 = vpop.f32.mrf.mxu1  ;;  %v4167_v28 = vld [vmem:[%s5564_s1 + $0x26c] ss:$48 sps:$4 sm:$0xff]  }
 0x11b   : > { %2868 = vmatprep.subr.bf16.mxu1 %v4092_v29  ;;  %v4170_v29 = vld [vmem:[%s5564_s1 + $0x86c] ss:$48 sps:$4 sm:$0xff]  }
 0x11d   : > { %2826 = vmatpush1.bf16.msra.mxu0 %v4087_v30 }
 0x11e   : > { %2869 = vmatpush1.bf16.msra.mxu1 %v4090_v31  ;;  %2827 = vmatprep.subr.bf16.mxu0 %v4095_v32 }
 0x11f   : > { %2870 = vmatprep.subr.bf16.mxu1 %v4098_v33  ;;  %v4165_v33 = vld [vmem:[%s5564_s1 + $0x268] ss:$48 sps:$4 sm:$0xff]  }
 0x121   : > { %2828 = vmatpush1.bf16.msra.mxu0 %v4093_v34  ;;  %v4168_v34 = vld [vmem:[%s5564_s1 + $0x868] ss:$48 sps:$4 sm:$0xff]  }
 0x122   : > { %2871 = vmatpush1.bf16.msra.mxu1 %v4096_v35  ;;  %2829 = vmatprep.subr.bf16.mxu0 %v4101_v36 }
 0x123   : > { %2872 = vmatprep.subr.bf16.mxu1 %v4104_v37  ;;  %v4173_v37 = vld [vmem:[%s5564_s1 + $0x20c] ss:$48 sps:$4 sm:$0xff]  }
 0x125   : > { %2830 = vmatpush1.bf16.msra.mxu0 %v4099_v38  ;;  %v4176_v38 = vld [vmem:[%s5564_s1 + $0x80c] ss:$48 sps:$4 sm:$0xff]  }
 0x126   : > { %2873 = vmatpush1.bf16.msra.mxu1 %v4102_v39  ;;  %2831 = vmatprep.subr.bf16.mxu0 %v4107_v40 }
 0x127   : > { %2874 = vmatprep.subr.bf16.mxu1 %v4110_v41 }
 0x129   : > { %2832 = vmatpush1.bf16.msra.mxu0 %v4105_v42  ;;  %v4171_v42 = vld [vmem:[%s5564_s1 + $0x208] ss:$48 sps:$4 sm:$0xff]  }
 0x12a   : > { %2875 = vmatpush1.bf16.msra.mxu1 %v4108_v43  ;;  %2833 = vmatprep.subr.bf16.mxu0 %v4113_v44  ;;  %v4174_v43 = vld [vmem:[%s5564_s1 + $0x808] ss:$48 sps:$4 sm:$0xff]  }
 0x12b   : > { %2876 = vmatprep.subr.bf16.mxu1 %v4116_v45  ;;  %v4177_v45 = vld [vmem:[%s5564_s1 + $0x1a8] ss:$48 sps:$4 sm:$0xff]  }
 0x12d   : > { %2834 = vmatpush2.bf16.msra.mxu0 %v4111_v46  ;;  %v4180_v46 = vld [vmem:[%s5564_s1 + $0x7a8] ss:$48 sps:$4 sm:$0xff]  }
 0x12e   : > { %2877 = vmatpush2.bf16.msra.mxu1 %v4114_v47  ;;  %2835 = vmatprep.subr.bf16.mxu0 %v4119_v49  ;;  %v4185_v47 = vld [vmem:[%s5564_s1 + $0x14c] ss:$48 sps:$4 sm:$0xff]  }
 0x12f   : > { %2878 = vmatprep.subr.bf16.mxu1 %v4122_v51  ;;  %v4188_v49 = vld [vmem:[%s5564_s1 + $0x74c] ss:$48 sps:$4 sm:$0xff]   ;;  %v4183_v51 = vld [vmem:[%s5564_s1 + $0x148] ss:$48 sps:$4 sm:$0xff]  }
 0x131   : > { %2836 = vmatpush2.bf16.msra.mxu0 %v4117_v52  ;;  %v4186_v52 = vld [vmem:[%s5564_s1 + $0x748] ss:$48 sps:$4 sm:$0xff]  }
 0x132   : > { %2879 = vmatpush2.bf16.msra.mxu1 %v4120_v53  ;;  %2837 = vmatprep.subr.bf16.mxu0 %v4125_v54  ;;  %v4191_v53 = vld [vmem:[%s5564_s1 + $0xec] ss:$48 sps:$4 sm:$0xff]  }
 0x133   : > { %2880 = vmatprep.subr.bf16.mxu1 %v4128_v55  ;;  %v4194_v54 = vld [vmem:[%s5564_s1 + $0x6ec] ss:$48 sps:$4 sm:$0xff]   ;;  %v4189_v55 = vld [vmem:[%s5564_s1 + $0xe8] ss:$48 sps:$4 sm:$0xff]  }
 0x135   : > { %2838 = vmatpush2.bf16.msra.mxu0 %v4123_v56  ;;  %v4192_v56 = vld [vmem:[%s5564_s1 + $0x6e8] ss:$48 sps:$4 sm:$0xff]  }
 0x136   : > { %2881 = vmatpush2.bf16.msra.mxu1 %v4126_v57  ;;  %2839 = vmatprep.subr.bf16.mxu0 %v4131_v58  ;;  %v4197_v57 = vld [vmem:[%s5564_s1 + $0x8c] ss:$48 sps:$4 sm:$0xff]  }
 0x137   : > { %2882 = vmatprep.subr.bf16.mxu1 %v4134_v59  ;;  %v4200_v58 = vld [vmem:[%s5564_s1 + $0x68c] ss:$48 sps:$4 sm:$0xff]   ;;  %v4195_v59 = vld [vmem:[%s5564_s1 + $0x88] ss:$48 sps:$4 sm:$0xff]  }
 0x139   : > { %2840 = vmatpush2.bf16.msra.mxu0 %v4129_v60  ;;  %v4198_v60 = vld [vmem:[%s5564_s1 + $0x688] ss:$48 sps:$4 sm:$0xff]  }
 0x13a   : > { %2883 = vmatpush2.bf16.msra.mxu1 %v4132_v61  ;;  %2841 = vmatprep.subr.bf16.mxu0 %v4137_v62  ;;  %v4203_v61 = vld [vmem:[%s5564_s1 + $0x2c] ss:$48 sps:$4 sm:$0xff]  }
 0x13b   : > { %2884 = vmatprep.subr.bf16.mxu1 %v4140_v63  ;;  %v4206_v62 = vld [vmem:[%s5564_s1 + $0x62c] ss:$48 sps:$4 sm:$0xff]   ;;  %v4201_v63 = vld [vmem:[%s5564_s1 + $0x28] ss:$48 sps:$4 sm:$0xff]  }
 0x13d   : > { %2842 = vmatpush2.bf16.msra.mxu0 %v4135_v0  ;;  %v4204_v0 = vld [vmem:[%s5564_s1 + $0x628] ss:$48 sps:$4 sm:$0xff]  }
 0x13e   : > { %2885 = vmatpush2.bf16.msra.mxu1 %v4138_v1  ;;  %2843 = vmatprep.subr.bf16.mxu0 %v4143_v2  ;;  %v4209_v1 = vld [vmem:[%s5564_s1 + $0x5cc] ss:$48 sps:$4 sm:$0xff]  }
 0x13f   : > { %2886 = vmatprep.subr.bf16.mxu1 %v4146_v3  ;;  %v4212_v2 = vld [vmem:[%s5564_s1 + $0xbcc] ss:$48 sps:$4 sm:$0xff]   ;;  %v4207_v3 = vld [vmem:[%s5564_s1 + $0x5c8] ss:$48 sps:$4 sm:$0xff]  }
 0x141   : > { %2844 = vmatpush2.bf16.msra.mxu0 %v4141_v6  ;;  %v4210_v6 = vld [vmem:[%s5564_s1 + $0xbc8] ss:$48 sps:$4 sm:$0xff]  }
 0x142   : > { %2887 = vmatpush2.bf16.msra.mxu1 %v4144_v7  ;;  %2845 = vmatprep.subr.bf16.mxu0 %v4149_v10  ;;  %v4215_v7 = vld [vmem:[%s5564_s1 + $0x56c] ss:$48 sps:$4 sm:$0xff]  }
 0x143   : > { %2888 = vmatprep.subr.bf16.mxu1 %v4152_v11  ;;  %v4218_v10 = vld [vmem:[%s5564_s1 + $0xb6c] ss:$48 sps:$4 sm:$0xff]   ;;  %v4213_v11 = vld [vmem:[%s5564_s1 + $0x568] ss:$48 sps:$4 sm:$0xff]  }
 0x145   : > { %2846 = vmatpush2.bf16.msra.mxu0 %v4147_v12  ;;  %v4216_v12 = vld [vmem:[%s5564_s1 + $0xb68] ss:$48 sps:$4 sm:$0xff]  }
 0x146   : > { %2889 = vmatpush2.bf16.msra.mxu1 %v4150_v13  ;;  %2847 = vmatprep.subr.bf16.mxu0 %v4155_v16  ;;  %v4221_v13 = vld [vmem:[%s5564_s1 + $0x50c] ss:$48 sps:$4 sm:$0xff]  }
 0x147   : > { %2890 = vmatprep.subr.bf16.mxu1 %v4158_v17  ;;  %v4224_v16 = vld [vmem:[%s5564_s1 + $0xb0c] ss:$48 sps:$4 sm:$0xff]   ;;  %v4219_v17 = vld [vmem:[%s5564_s1 + $0x508] ss:$48 sps:$4 sm:$0xff]  }
 0x149   : > { %2848 = vmatpush2.bf16.msra.mxu0 %v4153_v20  ;;  %v4222_v20 = vld [vmem:[%s5564_s1 + $0xb08] ss:$48 sps:$4 sm:$0xff]  }
 0x14a   : > { %2891 = vmatpush2.bf16.msra.mxu1 %v4156_v48  ;;  %2903 = vmatprep.subr.bf16.mxu0 %v4161_v22  ;;  %v4227_v48 = vld [vmem:[%s5564_s1 + $0x4ac] ss:$48 sps:$4 sm:$0xff]  }
 0x14b   : > { %2946 = vmatprep.subr.bf16.mxu1 %v4164_v23  ;;  %v4230_v22 = vld [vmem:[%s5564_s1 + $0xaac] ss:$48 sps:$4 sm:$0xff]   ;;  %v4225_v23 = vld [vmem:[%s5564_s1 + $0x4a8] ss:$48 sps:$4 sm:$0xff]  }
 0x14c   : > { %v2593_v30 = vpop.f32.mrf.mxu0  ;;  %2850 = vmatmul.mubr.bf16.vlgmr.msra.gmra.mxu0 %v5130_v18 }
 0x14d   : > { %v2636_v31 = vpop.f32.mrf.mxu1  ;;  %2893 = vmatmul.mubr.bf16.vlgmr.msra.gmra.mxu1 %v5134_v4  ;;  %2904 = vmatpush1.bf16.msra.mxu0 %v4159_v24  ;;  %v4228_v24 = vld [vmem:[%s5564_s1 + $0xaa8] ss:$48 sps:$4 sm:$0xff]  }
 0x14e   : > { %v5349_v32 = vadd.f32 %v2636_v31, %v2593_v30  ;;  %2947 = vmatpush1.bf16.msra.mxu1 %v4162_v25  ;;  %v5357_v35 = vpop.f32.mrf.mxu0  ;;  %2905 = vmatprep.subr.bf16.mxu0 %v4167_v28  ;;  %v4233_v25 = vld [vmem:[%s5564_s1 + $0x44c] ss:$48 sps:$4 sm:$0xff]   ;;  %v4234_v30 = vld [vmem:[%s5564_s1 + $0xa48] ss:$48 sps:$4 sm:$0xff]  }
 0x14f   : > { %v5359_v36 = vpop.f32.mrf.mxu1  ;;  %2948 = vmatprep.subr.bf16.mxu1 %v4170_v29  ;;  %2935 = vmatprep.mubr.bf16.mxu0 %v4942_v5  ;;  %v4179_v5 = vld [vmem:[%s5564_s1 + $0x1ac] ss:$48 sps:$4 sm:$0xff]   ;;  %v4231_v29 = vld [vmem:[%s5564_s1 + $0x448] ss:$48 sps:$4 sm:$0xff]  }
 0x150   : > { %2978 = vmatprep.mubr.bf16.mxu1 %v4946_v19  ;;  %v2597_v39 = vpop.f32.mrf.mxu0  ;;  %v4182_v19 = vld [vmem:[%s5564_s1 + $0x7ac] ss:$48 sps:$4 sm:$0xff]  }
 0x151   : > { %v2640_v40 = vpop.f32.mrf.mxu1  ;;  %2906 = vmatpush1.bf16.msra.mxu0 %v4165_v33  ;;  %v4236_v28 = vld [vmem:[%s5564_s1 + $0xa4c] ss:$48 sps:$4 sm:$0xff]  }
 0x152   : > { %v5369_v41 = vadd.f32 %v2640_v40, %v2597_v39  ;;  %2949 = vmatpush1.bf16.msra.mxu1 %v4168_v34  ;;  %2907 = vmatprep.subr.bf16.mxu0 %v4173_v37  ;;  %v4239_v31 = vld [vmem:[%s5564_s1 + $0x3ec] ss:$48 sps:$4 sm:$0xff]   ;;  %v4237_v34 = vld [vmem:[%s5564_s1 + $0x3e8] ss:$48 sps:$4 sm:$0xff]  }
 0x153   : > { %2950 = vmatprep.subr.bf16.mxu1 %v4176_v38  ;;  %v4242_v33 = vld [vmem:[%s5564_s1 + $0x9ec] ss:$48 sps:$4 sm:$0xff]   ;;  %v4240_v37 = vld [vmem:[%s5564_s1 + $0x9e8] ss:$48 sps:$4 sm:$0xff]  }
 0x154   : > { %v2991_v44 = vpack.c.bf16 %v5369_v41, %v5349_v32  ;;  %v4245_v38 = vld [vmem:[%s5564_s1 + $0x38c] ss:$48 sps:$4 sm:$0xff]   ;;  %v4243_v40 = vld [vmem:[%s5564_s1 + $0x388] ss:$48 sps:$4 sm:$0xff]  }
 0x155   : > { %2908 = vmatpush1.bf16.msra.mxu0 %v4171_v42  ;;  %v4248_v39 = vld [vmem:[%s5564_s1 + $0x98c] ss:$48 sps:$4 sm:$0xff]   ;;  %v4246_v42 = vld [vmem:[%s5564_s1 + $0x988] ss:$48 sps:$4 sm:$0xff]  }
 0x156   : > { %2951 = vmatpush1.bf16.msra.mxu1 %v4174_v43  ;;  %2909 = vmatprep.subr.bf16.mxu0 %v4179_v5  ;;  %v4251_v43 = vld [vmem:[%s5564_s1 + $0x32c] ss:$48 sps:$4 sm:$0xff]  }
 0x157   : > { %2952 = vmatprep.subr.bf16.mxu1 %v4182_v19  ;;  %v4254_v5 = vld [vmem:[%s5564_s1 + $0x92c] ss:$48 sps:$4 sm:$0xff]   ;;  %v2599_v19 = vpop.f32.mrf.mxu0 }
 0x159   : > { %2910 = vmatpush1.bf16.msra.mxu0 %v4177_v45  ;;  %v2642_v45 = vpop.f32.mrf.mxu1 }
 0x15a   : > { %2953 = vmatpush1.bf16.msra.mxu1 %v4180_v46  ;;  %2911 = vmatprep.subr.bf16.mxu0 %v4185_v47  ;;  %v4249_v46 = vld [vmem:[%s5564_s1 + $0x328] ss:$48 sps:$4 sm:$0xff]  }
 0x15b   : > { %2954 = vmatprep.subr.bf16.mxu1 %v4188_v49  ;;  %v4252_v47 = vld [vmem:[%s5564_s1 + $0x928] ss:$48 sps:$4 sm:$0xff]   ;;  %v2557_v49 = vadd.f32 %v5339_v27, %v5337_v26 }
 0x15d   : > { %2912 = vmatpush1.bf16.msra.mxu0 %v4183_v51  ;;  %v2643_v51 = vadd.f32 %v2642_v45, %v2599_v19 }
 0x15e   : > { %2955 = vmatpush1.bf16.msra.mxu1 %v4186_v52  ;;  %2913 = vmatprep.subr.bf16.mxu0 %v4191_v53  ;;  %v2553_v52 = vadd.f32 %v5307_v15, %v5305_v14  ;;  %v2639_v53 = vadd.f32 %v5359_v36, %v5357_v35 }
 0x15f   : > { %2956 = vmatprep.subr.bf16.mxu1 %v4194_v54 }
 0x160   : > { %v2990_v54 = vpack.c.bf16 %v2557_v49, %v2553_v52 }
 0x161   : > { %2914 = vmatpush1.bf16.msra.mxu0 %v4189_v55  ;;  %v2992_v55 = vpack.c.bf16 %v2643_v51, %v2639_v53 }
 0x162   : > { %2957 = vmatpush1.bf16.msra.mxu1 %v4192_v56  ;;  %2915 = vmatprep.subr.bf16.mxu0 %v4197_v57 }
 0x163   : > { %2958 = vmatprep.subr.bf16.mxu1 %v4200_v58 }
 0x165   : > { %2916 = vmatpush1.bf16.msra.mxu0 %v4195_v59 }
 0x166   : > { %2959 = vmatpush1.bf16.msra.mxu1 %v4198_v60  ;;  %2917 = vmatprep.subr.bf16.mxu0 %v4203_v61 }
 0x167   : > { %2960 = vmatprep.subr.bf16.mxu1 %v4206_v62 }
 0x169   : > { %2918 = vmatpush1.bf16.msra.mxu0 %v4201_v63 }
 0x16a   : > { %2961 = vmatpush1.bf16.msra.mxu1 %v4204_v0  ;;  %2919 = vmatprep.subr.bf16.mxu0 %v4209_v1 }
 0x16b   : > { %2962 = vmatprep.subr.bf16.mxu1 %v4212_v2 }
 0x16d   : > { %2920 = vmatpush2.bf16.msra.mxu0 %v4207_v3 }
 0x16e   : > { %2963 = vmatpush2.bf16.msra.mxu1 %v4210_v6  ;;  %2921 = vmatprep.subr.bf16.mxu0 %v4215_v7 }
 0x16f   : > { %2964 = vmatprep.subr.bf16.mxu1 %v4218_v10 }
 0x171   : > { %2922 = vmatpush2.bf16.msra.mxu0 %v4213_v11 }
 0x172   : > { %2965 = vmatpush2.bf16.msra.mxu1 %v4216_v12  ;;  %2923 = vmatprep.subr.bf16.mxu0 %v4221_v13 }
 0x173   : > { %2966 = vmatprep.subr.bf16.mxu1 %v4224_v16 }
 0x175   : > { %2924 = vmatpush2.bf16.msra.mxu0 %v4219_v17 }
 0x176   : > { %2967 = vmatpush2.bf16.msra.mxu1 %v4222_v20  ;;  %2925 = vmatprep.subr.bf16.mxu0 %v4227_v48 }
 0x177   : > { %2968 = vmatprep.subr.bf16.mxu1 %v4230_v22 }
 0x179   : > { %2926 = vmatpush2.bf16.msra.mxu0 %v4225_v23 }
 0x17a   : > { %2969 = vmatpush2.bf16.msra.mxu1 %v4228_v24  ;;  %2927 = vmatprep.subr.bf16.mxu0 %v4233_v25 }
 0x17b   : > { %2970 = vmatprep.subr.bf16.mxu1 %v4236_v28 }
 0x17d   : > { %2928 = vmatpush2.bf16.msra.mxu0 %v4231_v29 }
 0x17e   : > { %2971 = vmatpush2.bf16.msra.mxu1 %v4234_v30  ;;  %2929 = vmatprep.subr.bf16.mxu0 %v4239_v31 }
 0x17f   : > { %2972 = vmatprep.subr.bf16.mxu1 %v4242_v33 }
 0x181   : > { %2930 = vmatpush2.bf16.msra.mxu0 %v4237_v34 }
 0x182   : > { %2973 = vmatpush2.bf16.msra.mxu1 %v4240_v37  ;;  %2931 = vmatprep.subr.bf16.mxu0 %v4245_v38 }
 0x183   : > { %2974 = vmatprep.subr.bf16.mxu1 %v4248_v39 }
 0x185   : > { %2932 = vmatpush2.bf16.msra.mxu0 %v4243_v40 }
 0x186   : > { %2975 = vmatpush2.bf16.msra.mxu1 %v4246_v42  ;;  %2933 = vmatprep.subr.bf16.mxu0 %v4251_v43 }
 0x187   : > { %2976 = vmatprep.subr.bf16.mxu1 %v4254_v5 }
 0x189   : > { %2934 = vmatpush2.bf16.msra.mxu0 %v4249_v46 }
 0x18a   : > { %2977 = vmatpush2.bf16.msra.mxu1 %v4252_v47 }
 0x18c   : > { %v2679_v56 = vpop.f32.mrf.mxu0  ;;  %2936 = vmatmul.mubr.bf16.vlgmr.msra.gmra.mxu0 %v5130_v18  ;;  %v2555_v18 = vadd.f32 %v5323_v21, %v5321_v50 }
 0x18d   : > { %v2722_v57 = vpop.f32.mrf.mxu1  ;;  %2979 = vmatmul.mubr.bf16.vlgmr.msra.gmra.mxu1 %v5134_v4  ;;  %3033 = vmatprep.mubr.bf16.mxu0 %v2990_v54  ;;  %v2551_v4 = vadd.f32 %v5291_v9, %v5289_v8 }
 0x18e   : > { %3074 = vmatprep.mubr.bf16.mxu1 %v2992_v55  ;;  %v2681_v26 = vpop.f32.mrf.mxu0  ;;  %v2723_v61 = vadd.f32 %v2722_v57, %v2679_v56 }
 0x18f   : > { %v2724_v27 = vpop.f32.mrf.mxu1  ;;  %v2989_v0 = vpack.c.bf16 %v2555_v18, %v2551_v4 }
 0x190   : > { %v2683_v58 = vpop.f32.mrf.mxu0  ;;  %v2725_v35 = vadd.f32 %v2724_v27, %v2681_v26 }
 0x191   : > { %v2726_v59 = vpop.f32.mrf.mxu1 }
 0x192   : > { %v2727_v14 = vadd.f32 %v2726_v59, %v2683_v58  ;;  %v2685_v15 = vpop.f32.mrf.mxu0 }
 0x193   : > { %v2728_v60 = vpop.f32.mrf.mxu1 }
 0x194   : > { %v2729_v36 = vadd.f32 %v2728_v60, %v2685_v15  ;;  %v2993_v63 = vpack.c.bf16 %v2727_v14, %v2723_v61 }
 0x196   : > { %v2994_v62 = vpack.c.bf16 %v2729_v36, %v2725_v35 }
 0x198   : > { %3015 = vmatprep.subr.bf16.mxu0 %v2994_v62 }
 0x199   : > { %3016 = vmatpush1.bf16.xpose.msra.mxu0 %v2993_v63 }
 0x1a0   : > { %3034 = vmatmul.mubr.bf16.vlgmr.msra.gmra.mxu0 %v2989_v0 }
 0x1cc   : > { %v2765_v1 = vpop.f32.mrf.mxu0 }
 0x1cd   : > { %v2808_v2 = vpop.f32.mrf.mxu1 }
 0x1ce   : > { %v2767_v3 = vpop.f32.mrf.mxu0  ;;  %v2809_v20 = vadd.f32 %v2808_v2, %v2765_v1 }
 0x1cf   : > { %v2810_v6 = vpop.f32.mrf.mxu1 }
 0x1d0   : > { %v2769_v7 = vpop.f32.mrf.mxu0  ;;  %v2811_v16 = vadd.f32 %v2810_v6, %v2767_v3  ;;  %v4275_v3 = vmov 0  }
 0x1d1   : > { %v2812_v10 = vpop.f32.mrf.mxu1  ;;  %3144 = vmatprep.mubr.bf16.mxu0 %v4275_v3 }
 0x1d2   : > { %v2813_v11 = vadd.f32 %v2812_v10, %v2769_v7  ;;  %v2771_v12 = vpop.f32.mrf.mxu0 }
 0x1d3   : > { %v2814_v13 = vpop.f32.mrf.mxu1 }
 0x1d4   : > { %v2815_v17 = vadd.f32 %v2814_v13, %v2771_v12  ;;  %v2995_v22 = vpack.c.bf16 %v2813_v11, %v2809_v20 }
 0x1d6   : > { %v2996_v48 = vpack.c.bf16 %v2815_v17, %v2811_v16 }
 0x1d8   : > { %3056 = vmatprep.subr.bf16.mxu1 %v2996_v48 }
 0x1d9   : > { %3057 = vmatpush1.bf16.xpose.msra.mxu1 %v2995_v22 }
 0x1e0   : > { %3075 = vmatmul.mubr.bf16.vlgmr.msra.gmra.mxu1 %v2991_v44 }
 0x1e1   : > { %3187 = vmatprep.mubr.bf16.mxu1 %v4275_v3 }
 0x20c   : > { %v2851_v8 = vpop.f32.mrf.mxu0 }
 0x20d   : > { %v2894_v9 = vpop.f32.mrf.mxu1 }
 0x20e   : > { %v2853_v50 = vpop.f32.mrf.mxu0  ;;  %v2895_v23 = vadd.f32 %v2894_v9, %v2851_v8 }
 0x20f   : > { %v2896_v21 = vpop.f32.mrf.mxu1 }
 0x210   : > { %v2855_v24 = vpop.f32.mrf.mxu0  ;;  %v2897_v28 = vadd.f32 %v2896_v21, %v2853_v50 }
 0x211   : > { %v2898_v25 = vpop.f32.mrf.mxu1 }
 0x212   : > { %v2899_v29 = vadd.f32 %v2898_v25, %v2855_v24  ;;  %v2857_v30 = vpop.f32.mrf.mxu0 }
 0x213   : > { %v2900_v31 = vpop.f32.mrf.mxu1 }
 0x214   : > { %v2901_v33 = vadd.f32 %v2900_v31, %v2857_v30  ;;  %v2997_v34 = vpack.c.bf16 %v2899_v29, %v2895_v23 }
 0x216   : > { %v2998_v37 = vpack.c.bf16 %v2901_v33, %v2897_v28 }
 0x218   : > { %3126 = vmatprep.subr.bf16.mxu0 %v2998_v37 }
 0x219   : > { %3127 = vmatpush1.bf16.msra.mxu0 %v2997_v34 }
 0x24c   : > { %v2937_v38 = vpop.f32.mrf.mxu0 }
 0x24d   : > { %v2980_v39 = vpop.f32.mrf.mxu1 }
 0x24e   : > { %v2939_v32 = vpop.f32.mrf.mxu0  ;;  %v2981_v40 = vadd.f32 %v2980_v39, %v2937_v38 }
 0x24f   : > { %v2982_v41 = vpop.f32.mrf.mxu1 }
 0x250   : > { %v2941_v44 = vpop.f32.mrf.mxu0  ;;  %v2983_v43 = vadd.f32 %v2982_v41, %v2939_v32 }
 0x251   : > { %v2984_v42 = vpop.f32.mrf.mxu1 }
 0x252   : > { %v2985_v5 = vadd.f32 %v2984_v42, %v2941_v44  ;;  %v2943_v19 = vpop.f32.mrf.mxu0 }
 0x253   : > { %v2986_v45 = vpop.f32.mrf.mxu1 }
 0x254   : > { %v2987_v46 = vadd.f32 %v2986_v45, %v2943_v19  ;;  %v2999_v47 = vpack.c.bf16 %v2985_v5, %v2981_v40 }
 0x256   : > { %v3000_v49 = vpack.c.bf16 %v2987_v46, %v2983_v43 }
 0x258   : > { %3169 = vmatprep.subr.bf16.mxu1 %v3000_v49 }
 0x259   : > { %3170 = vmatpush1.bf16.msra.mxu1 %v2999_v47 }
 0x260   : > { %v3035_v51 = vpop.f32.mrf.mxu0 }
 0x262   : > { %v3037_v52 = vpop.f32.mrf.mxu0 }
 0x264   : > { %v3038_v53 = vpop.f32.mrf.mxu0 }
 0x266   : > { %v3040_v54 = vpop.f32.mrf.mxu0 }
 0x2a0   : > { %v3076_v55 = vpop.f32.mrf.mxu1 }
 0x2a1   : > { %v3077_v56 = vadd.f32 %v3076_v55, %v3035_v51 }
 0x2a2   : > { %v3078_v57 = vpop.f32.mrf.mxu1 }
 0x2a3   : > { %v3083_v26 = vmul.f32 0.044194173, %v3077_v56 }
 0x2a4   : > { %v3079_v27 = vpop.f32.mrf.mxu1 }
 0x2a5   : > { %v3080_v58 = vadd.f32 %v3079_v27, %v3038_v53  ;;  %v3086_v59 = vsel %vm3085_vm0, %v3083_v26, -inf }
 0x2a6   : > { %v3081_v14 = vpop.f32.mrf.mxu1  ;;  %3087 = vmax.xlane.f32.xlu0 %v3086_v59 }
 0x2a7   : > { %v3084_v15 = vmul.f32 0.044194173, %v3080_v58 }
 0x2a9   : > { %v3089_v60 = vsel %vm3085_vm0, %v3084_v15, -inf }
 0x2aa   : > { %3090 = vmax.xlane.f32.xlu0 %v3089_v60 }
 0x32f   : > { %v3088_v35 = vpop.xlane.xlu0 %3087 }
 0x330   : > { %v3092_v36 = vsub.f32 %v3083_v26, %v3088_v35 }
 0x332   : > { %v3094_v61 = vmul.f32 1.442695, %v3092_v36 }
 0x333   : > { %v3091_v62 = vpop.xlane.xlu0 %3090 }
 0x334   : > { %4255 = vpow2.f32 %v3094_v61  ;;  %v3093_v63 = vsub.f32 %v3084_v15, %v3091_v62 }
 0x336   : > { %v3096_v18 = vmul.f32 1.442695, %v3093_v63 }
 0x338   : > { %4257 = vpow2.f32 %v3096_v18 }
 0x341   : > { %v4256_v4 = vpop.eup %4255 }
 0x342   : > { %v3098_v0 = vsel %vm3085_vm0, %v4256_v4, 0.0 }
 0x343   : > { %3099 = vadd.xlane.f32.xlu1 %v3098_v0 }
 0x345   : > { %v4258_v1 = vpop.eup %4257 }
 0x346   : > { %v3101_v2 = vsel %vm3085_vm0, %v4258_v1, 0.0 }
 0x347   : > { %3102 = vadd.xlane.f32.xlu1 %v3101_v2 }
 0x3cc   : > { %v3100_v6 = vpop.xlane.xlu1 %3099 }
 0x3cd   : > { %4259 = vrcp.f32 %v3100_v6 }
 0x3d0   : > { %v3103_v7 = vpop.xlane.xlu1 %3102 }
 0x3d1   : > { %4261 = vrcp.f32 %v3103_v7 }
 0x3da   : > { %v4260_v10 = vpop.eup %4259 }
 0x3db   : > { %v3106_v13 = vmul.f32 %v4260_v10, %v4256_v4 }
 0x3de   : > { %v4262_v11 = vpop.eup %4261 }
 0x3df   : > { %v3107_v12 = vmul.f32 %v4262_v11, %v4258_v1 }
 0x3e1   : > { %v3108_v16 = vpack.c.bf16 %v3107_v12, %v3106_v13 }
 0x3e3   : > { %3658 = vmatmul.mubr.msk.bf16.vlgmr.msra.gmra.mxu0 %vm3085_vm0, %v3108_v16  ;;  %3659 = vmatmul.mubr.msk.bf16.vlgmr.msra.gmra.mxu1 %vm3085_vm0, %v3108_v16 }
 0x4a3   : > { %v3146_v17 = vpop.f32.mrf.mxu0  ;;  %v3189_v20 = vpop.f32.mrf.mxu1 }
 0x4a4   : > { %3198 = vst [vmem:[%s143_s22] sm:$0xff] %v3146_v17  ;;  %3200 = vst [vmem:[%s143_s22 + $0x10] sm:$0xff] %v3189_v20 }
 0x4a5   : > { %v3148_v48 = vpop.f32.mrf.mxu0  ;;  %v3191_v22 = vpop.f32.mrf.mxu1 }
 0x4a6   : > { %3199 = vst [vmem:[%s143_s22 + $0x8] sm:$0xff] %v3148_v48  ;;  %3201 = vst [vmem:[%s143_s22 + $0x18] sm:$0xff] %v3191_v22 }
 0x4a7   : > { %v3150_v8 = vpop.f32.mrf.mxu0  ;;  %v3193_v9 = vpop.f32.mrf.mxu1 }
 0x4a8   : > { %3202 = vst [vmem:[%s143_s22 + $0x20] sm:$0xff] %v3150_v8  ;;  %3204 = vst [vmem:[%s143_s22 + $0x30] sm:$0xff] %v3193_v9 }
 0x4a9   : > { %v3152_v50 = vpop.f32.mrf.mxu0  ;;  %v3195_v21 = vpop.f32.mrf.mxu1 }
 0x4aa   : > { %3203 = vst [vmem:[%s143_s22 + $0x28] sm:$0xff] %v3152_v50  ;;  %3205 = vst [vmem:[%s143_s22 + $0x38] sm:$0xff] %v3195_v21 }
 0x4ab PF: > { %s12_s9 = sadd.s32 1, %s4273_s9  }
 0x4ac   : > { %p9_p4 = scmp.ge.s32.totalorder %s12_s9, 4  }
 0x4ae   :  { %11 = sbr.rel (!%p9_p4) target bundleno = 1 (0x1), region = 58 }

</bundles_post_ra>
